<compile_context>
chip_gen: v7x
topology: tpu7x:2x2x1
jax: 0.10.0
libtpu: 0.0.40
codegen_flags: <defaults>
</compile_context>

<pallas_src>
import numpy as np

import jax
import jax.numpy as jnp
from jax.experimental import pallas as pl
from jax.experimental.pallas import tpu as pltpu


# ----------------------------- static geometry -----------------------------

IMG, CIN = 16, 3                       # input image (NCHW: (1, 3, 16, 16))
K1, S1, C1 = 4, 2, 16                  # conv1
K2, S2, C2 = 3, 1, 32                  # conv2
H1 = (IMG - K1) // S1 + 1              # 7
H2 = (H1 - K2) // S2 + 1               # 5
N1, N1P = H1 * H1, 56                  # 49 conv1 positions, padded to 56
N2, N2P = H2 * H2, 32                  # 25 conv2 positions, padded to 32
FLAT, FLATP = N2 * C2, N2P * C2        # 800 real / 1024 padded flatten rows
FEAT, ACT = 64, 8
PATCH1 = K1 * K1 * CIN                 # 48


def _build_sel2():
    """Stacked 0/1 gather matrix: SEL2[N2P*o + q, r] = 1 iff conv1 output row r
    feeds conv2 output position q at kernel offset o.  Compile-time constant."""
    sel = np.zeros((K2 * K2 * N2P, N1P), dtype=np.float32)     # (288, 56)
    for i in range(H2):
        for j in range(H2):
            q = i * H2 + j
            for kh in range(K2):
                for kw in range(K2):
                    o = kh * K2 + kw
                    r = H1 * (S2 * i + kh) + (S2 * j + kw)
                    sel[N2P * o + q, r] = 1.0
    return sel


_SEL2 = _build_sel2()

# advisory cost for XLA scheduling around the custom call
_FLOPS = 2 * (N1P * PATCH1 * C1                 # conv1 matmul
              + (K2 * K2 * N2P) * N1P * C1      # conv2 gather matmul
              + K2 * K2 * N2P * C1 * C2         # conv2 weight dots
              + FLATP * FEAT                    # fc matmul
              + FEAT * ACT)                     # action head
_BYTES = 4 * (N1P * PATCH1 + K2 * K2 * N2P * N1P + PATCH1 * C1
              + K2 * K2 * C1 * C2 + FLATP * FEAT + FEAT * ACT
              + 4 * 128 + ACT)


def _tree_sum(xs):
    """Pairwise (balanced) reduction so partial sums stay independent."""
    xs = list(xs)
    while len(xs) > 1:
        nxt = [xs[i] + xs[i + 1] for i in range(0, len(xs) - 1, 2)]
        if len(xs) % 2:
            nxt.append(xs[-1])
        xs = nxt
    return xs[0]


# ------------------------------ fused kernel -------------------------------

def _policy_kernel(patches_ref, sel2_ref, w1_ref, w2_ref, fcw_ref,
                   actw_ref, bias_ref, o_ref, flat_ref):
    f32 = jnp.float32

    # unpack the bias bundle (one (4,128) operand instead of four tiny ones)
    b1 = bias_ref[0:1, 0:C1]            # (1, 16)
    b2 = bias_ref[1:2, 0:C2]            # (1, 32)
    fcb = bias_ref[2:3, 0:FEAT]         # (1, 64)
    actb = bias_ref[3:4, 0:ACT]         # (1, 8)

    # ---- conv1: host-side im2col, 1/255 folded into w1 -> ONE matmul -------
    h1 = jnp.maximum(
        jnp.dot(patches_ref[...], w1_ref[...], preferred_element_type=f32) + b1,
        0.0)                                                     # (56, 16)

    # ---- conv2: stacked gather matmul + 9 independent weight dots ----------
    # patches_all[32*o + q, :] = h1[src(q, o), :]; padded q rows are all-zero.
    patches_all = jnp.dot(sel2_ref[...], h1,
                          preferred_element_type=f32)            # (288, 16)
    parts = []
    for o in range(K2 * K2):
        p = patches_all[N2P * o:N2P * (o + 1), :]                # (32, 16)
        parts.append(jnp.dot(p, w2_ref[C1 * o:C1 * (o + 1), :],
                             preferred_element_type=f32))        # (32, 32)
    acc2 = _tree_sum(parts)
    h2 = jnp.maximum(acc2 + b2, 0.0)                             # (32, 32)

    # ---- flatten (NHWC, index 32*q + c) via a (1,1024) VMEM scratch --------
    # 32 cheap masked stores replace a value relayout; padded rows q>=25 hold
    # relu(b2) but hit exactly-zero fc_w rows (host-padded), so they vanish.
    for q in range(N2P):
        flat_ref[0:1, C2 * q:C2 * (q + 1)] = h2[q:q + 1, :]

    # ---- Linear(800->64)+ReLU as ONE (1,1024)x(1024,64) matmul -------------
    feat = jnp.maximum(
        jnp.dot(flat_ref[...], fcw_ref[...], preferred_element_type=f32) + fcb,
        0.0)                                                     # (1, 64)

    # ---- action head + log_softmax == Categorical(logits).log_prob(0..7) ---
    logits = jnp.dot(feat, actw_ref[...], preferred_element_type=f32) + actb
    m = jnp.max(logits, axis=-1, keepdims=True)
    z = logits - m
    lse = jnp.log(jnp.sum(jnp.exp(z), axis=-1, keepdims=True))
    o_ref[...] = z - lse                                         # (1, 8)


# --------------------------------- wrapper ---------------------------------

def _im2col(x, k, s):
    """NHWC im2col; column order = (kh, kw) offset-major, channel-minor."""
    N, H, W, C = x.shape
    Ho, Wo = (H - k) // s + 1, (W - k) // s + 1
    patches = [x[:, i:i + s * Ho:s, j:j + s * Wo:s, :]
               for i in range(k) for j in range(k)]
    p = jnp.stack(patches, axis=3)                  # (N, Ho, Wo, k*k, C)
    return p.reshape(N * Ho * Wo, k * k * C), (N, Ho, Wo)


def pack_params(params):
    """One-time host-side weight prep for the kernel operand layout."""
    fcw_pad = jnp.zeros((FLATP, FEAT), jnp.float32)
    fcw_pad = fcw_pad.at[:FLAT, :].set(params["fc_w"])           # rows 800..1023 exactly 0
    bias = jnp.zeros((4, 128), jnp.float32)
    bias = bias.at[0, :C1].set(params["conv1_b"])
    bias = bias.at[1, :C2].set(params["conv2_b"])
    bias = bias.at[2, :FEAT].set(params["fc_b"])
    bias = bias.at[3, :ACT].set(params["act_b"])
    return {
        "w1": params["conv1_w"] * (1.0 / 255.0),   # /255 folded into conv1 weights
        "w2": params["conv2_w"],
        "fcw": fcw_pad,
        "actw": params["act_w"],
        "bias": bias,
        "sel2": jnp.asarray(_SEL2),
    }


@jax.jit
def visual_policy_forward(obs_nchw, packed):
    """obs_nchw: (1, 3, 16, 16) uint8 -> (1, 8) f32 log-probabilities."""
    # conv1 im2col hoisted to XLA: constant-shape layout plumbing only.
    x = jnp.transpose(obs_nchw.astype(jnp.float32), (0, 2, 3, 1))     # (1,16,16,3)
    p1, _ = _im2col(x, K1, S1)                                        # (49, 48)
    patches = jnp.pad(p1, ((0, N1P - N1), (0, 0)))                    # (56, 48)

    vmem = pl.BlockSpec(memory_space=pltpu.MemorySpace.VMEM)
    return pl.pallas_call(
        _policy_kernel,
        out_shape=jax.ShapeDtypeStruct((1, ACT), jnp.float32),
        in_specs=[vmem] * 7,
        out_specs=vmem,
        scratch_shapes=[pltpu.VMEM((1, FLATP), jnp.float32)],
        cost_estimate=pl.CostEstimate(flops=_FLOPS, transcendentals=ACT + 1,
                                      bytes_accessed=_BYTES),
    )(patches, packed["sel2"], packed["w1"], packed["w2"],
      packed["fcw"], packed["actw"], packed["bias"])


# -------------------------- synthetic parameters ---------------------------

def init_params(key):
    ks = jax.random.split(key, 8)
    s = 0.05
    return {
        # conv weights laid out as (kh*kw*cin, cout), offset-major (kh, kw, cin)
        "conv1_w": s * jax.random.normal(ks[0], (PATCH1, C1), jnp.float32),
        "conv1_b": s * jax.random.normal(ks[1], (C1,), jnp.float32),
        "conv2_w": s * jax.random.normal(ks[2], (K2 * K2 * C1, C2), jnp.float32),
        "conv2_b": s * jax.random.normal(ks[3], (C2,), jnp.float32),
        "fc_w":   s * jax.random.normal(ks[4], (FLAT, FEAT), jnp.float32),
        "fc_b":   s * jax.random.normal(ks[5], (FEAT,), jnp.float32),
        "act_w":  s * jax.random.normal(ks[6], (FEAT, ACT), jnp.float32),
        "act_b":  s * jax.random.normal(ks[7], (ACT,), jnp.float32),
    }


# ----------------------------- pure-JAX reference --------------------------

def reference_forward(obs_nchw, params):
    x = jnp.transpose(obs_nchw.astype(jnp.float32) / 255.0, (0, 2, 3, 1))
    p1, shp1 = _im2col(x, K1, S1)
    h1 = jnp.maximum(p1 @ params["conv1_w"] + params["conv1_b"], 0.0)
    h1 = h1.reshape(shp1 + (C1,))
    p2, shp2 = _im2col(h1, K2, S2)
    h2 = jnp.maximum(p2 @ params["conv2_w"] + params["conv2_b"], 0.0)
    h2 = h2.reshape(shp2 + (C2,))
    flat = h2.reshape(1, -1)
    feat = jnp.maximum(flat @ params["fc_w"] + params["fc_b"], 0.0)
    logits = feat @ params["act_w"] + params["act_b"]
    return jax.nn.log_softmax(logits, axis=-1)


# ----------------------------------- main -----------------------------------

if __name__ == "__main__":
    key = jax.random.PRNGKey(0)
    k_obs, k_params = jax.random.split(key)

    obs = jax.random.randint(k_obs, (1, CIN, IMG, IMG), 0, 256,
                             dtype=jnp.int32).astype(jnp.uint8)
    params = init_params(k_params)
    packed = pack_params(params)

    out = jax.block_until_ready(visual_policy_forward(obs, packed))

    assert out.shape == (1, ACT), out.shape
    assert out.dtype == jnp.float32
    # log-probs must exponentiate-sum to 1.
    assert abs(float(jnp.sum(jnp.exp(out))) - 1.0) < 1e-4
    # match the pure-JAX reference forward pass.
    ref = jax.block_until_ready(reference_forward(obs, params))
    assert bool(jnp.allclose(out, ref, atol=3e-3, rtol=3e-3)), (out, ref)

    print("KERNEL_OK")
</pallas_src>

<mosaic_0001>
module attributes {stable_mosaic.version = 11 : i64} {
  func.func @_policy_kernel(%arg0: memref<56x48xf32, #tpu.memory_space<vmem>>, %arg1: memref<288x56xf32, #tpu.memory_space<vmem>>, %arg2: memref<48x16xf32, #tpu.memory_space<vmem>>, %arg3: memref<144x32xf32, #tpu.memory_space<vmem>>, %arg4: memref<1024x64xf32, #tpu.memory_space<vmem>>, %arg5: memref<64x8xf32, #tpu.memory_space<vmem>>, %arg6: memref<4x128xf32, #tpu.memory_space<vmem>>, %arg7: memref<1x8xf32, #tpu.memory_space<vmem>>, %arg8: memref<1x1024xf32, #tpu.memory_space<vmem>>) attributes {dimension_semantics = [], scalar_prefetch = 0 : i64, scratch_operands = 1 : i64, tpu.core_type = #tpu.core_type<tc>} {
    %c0 = arith.constant 0 : index
    %c0_0 = arith.constant 0 : index
    %0 = vector.load %arg6[%c0, %c0_0] : memref<4x128xf32, #tpu.memory_space<vmem>>, vector<1x16xf32>
    %c1 = arith.constant 1 : index
    %c0_1 = arith.constant 0 : index
    %1 = vector.load %arg6[%c1, %c0_1] : memref<4x128xf32, #tpu.memory_space<vmem>>, vector<1x32xf32>
    %c2 = arith.constant 2 : index
    %c0_2 = arith.constant 0 : index
    %2 = vector.load %arg6[%c2, %c0_2] : memref<4x128xf32, #tpu.memory_space<vmem>>, vector<1x64xf32>
    %c3 = arith.constant 3 : index
    %c0_3 = arith.constant 0 : index
    %3 = vector.load %arg6[%c3, %c0_3] : memref<4x128xf32, #tpu.memory_space<vmem>>, vector<1x8xf32>
    %c0_4 = arith.constant 0 : index
    %c0_5 = arith.constant 0 : index
    %4 = vector.load %arg0[%c0_4, %c0_5] : memref<56x48xf32, #tpu.memory_space<vmem>>, vector<56x48xf32>
    %c0_6 = arith.constant 0 : index
    %c0_7 = arith.constant 0 : index
    %5 = vector.load %arg2[%c0_6, %c0_7] : memref<48x16xf32, #tpu.memory_space<vmem>>, vector<48x16xf32>
    %cst = arith.constant dense<0.000000e+00> : vector<56x16xf32>
    %6 = tpu.matmul %4, %5, %cst {dimension_numbers = #tpu.dot_dimension_numbers<[1], [0], [0], [1], [0, 0, 1, 1], [], []>} : vector<56x48xf32>, vector<48x16xf32>, vector<56x16xf32> -> vector<56x16xf32>
    %7 = vector.broadcast %0 : vector<1x16xf32> to vector<56x16xf32>
    %8 = arith.addf %6, %7 : vector<56x16xf32>
    %cst_8 = arith.constant 0.000000e+00 : f32
    %9 = vector.broadcast %cst_8 : f32 to vector<56x16xf32>
    %10 = arith.maximumf %8, %9 : vector<56x16xf32>
    %c0_9 = arith.constant 0 : index
    %c0_10 = arith.constant 0 : index
    %11 = vector.load %arg1[%c0_9, %c0_10] : memref<288x56xf32, #tpu.memory_space<vmem>>, vector<288x56xf32>
    %cst_11 = arith.constant dense<0.000000e+00> : vector<288x16xf32>
    %12 = tpu.matmul %11, %10, %cst_11 {dimension_numbers = #tpu.dot_dimension_numbers<[1], [0], [0], [1], [0, 0, 1, 1], [], []>} : vector<288x56xf32>, vector<56x16xf32>, vector<288x16xf32> -> vector<288x16xf32>
    %13 = vector.extract_strided_slice %12 {offsets = [0, 0], sizes = [32, 16], strides = [1, 1]} : vector<288x16xf32> to vector<32x16xf32>
    %c0_12 = arith.constant 0 : index
    %c0_13 = arith.constant 0 : index
    %14 = vector.load %arg3[%c0_12, %c0_13] : memref<144x32xf32, #tpu.memory_space<vmem>>, vector<16x32xf32>
    %cst_14 = arith.constant dense<0.000000e+00> : vector<32x32xf32>
    %15 = tpu.matmul %13, %14, %cst_14 {dimension_numbers = #tpu.dot_dimension_numbers<[1], [0], [0], [1], [0, 0, 1, 1], [], []>} : vector<32x16xf32>, vector<16x32xf32>, vector<32x32xf32> -> vector<32x32xf32>
    %16 = vector.extract_strided_slice %12 {offsets = [32, 0], sizes = [32, 16], strides = [1, 1]} : vector<288x16xf32> to vector<32x16xf32>
    %c16 = arith.constant 16 : index
    %c0_15 = arith.constant 0 : index
    %17 = vector.load %arg3[%c16, %c0_15] : memref<144x32xf32, #tpu.memory_space<vmem>>, vector<16x32xf32>
    %cst_16 = arith.constant dense<0.000000e+00> : vector<32x32xf32>
    %18 = tpu.matmul %16, %17, %cst_16 {dimension_numbers = #tpu.dot_dimension_numbers<[1], [0], [0], [1], [0, 0, 1, 1], [], []>} : vector<32x16xf32>, vector<16x32xf32>, vector<32x32xf32> -> vector<32x32xf32>
    %19 = vector.extract_strided_slice %12 {offsets = [64, 0], sizes = [32, 16], strides = [1, 1]} : vector<288x16xf32> to vector<32x16xf32>
    %c32 = arith.constant 32 : index
    %c0_17 = arith.constant 0 : index
    %20 = vector.load %arg3[%c32, %c0_17] : memref<144x32xf32, #tpu.memory_space<vmem>>, vector<16x32xf32>
    %cst_18 = arith.constant dense<0.000000e+00> : vector<32x32xf32>
    %21 = tpu.matmul %19, %20, %cst_18 {dimension_numbers = #tpu.dot_dimension_numbers<[1], [0], [0], [1], [0, 0, 1, 1], [], []>} : vector<32x16xf32>, vector<16x32xf32>, vector<32x32xf32> -> vector<32x32xf32>
    %22 = vector.extract_strided_slice %12 {offsets = [96, 0], sizes = [32, 16], strides = [1, 1]} : vector<288x16xf32> to vector<32x16xf32>
    %c48 = arith.constant 48 : index
    %c0_19 = arith.constant 0 : index
    %23 = vector.load %arg3[%c48, %c0_19] : memref<144x32xf32, #tpu.memory_space<vmem>>, vector<16x32xf32>
    %cst_20 = arith.constant dense<0.000000e+00> : vector<32x32xf32>
    %24 = tpu.matmul %22, %23, %cst_20 {dimension_numbers = #tpu.dot_dimension_numbers<[1], [0], [0], [1], [0, 0, 1, 1], [], []>} : vector<32x16xf32>, vector<16x32xf32>, vector<32x32xf32> -> vector<32x32xf32>
    %25 = vector.extract_strided_slice %12 {offsets = [128, 0], sizes = [32, 16], strides = [1, 1]} : vector<288x16xf32> to vector<32x16xf32>
    %c64 = arith.constant 64 : index
    %c0_21 = arith.constant 0 : index
    %26 = vector.load %arg3[%c64, %c0_21] : memref<144x32xf32, #tpu.memory_space<vmem>>, vector<16x32xf32>
    %cst_22 = arith.constant dense<0.000000e+00> : vector<32x32xf32>
    %27 = tpu.matmul %25, %26, %cst_22 {dimension_numbers = #tpu.dot_dimension_numbers<[1], [0], [0], [1], [0, 0, 1, 1], [], []>} : vector<32x16xf32>, vector<16x32xf32>, vector<32x32xf32> -> vector<32x32xf32>
    %28 = vector.extract_strided_slice %12 {offsets = [160, 0], sizes = [32, 16], strides = [1, 1]} : vector<288x16xf32> to vector<32x16xf32>
    %c80 = arith.constant 80 : index
    %c0_23 = arith.constant 0 : index
    %29 = vector.load %arg3[%c80, %c0_23] : memref<144x32xf32, #tpu.memory_space<vmem>>, vector<16x32xf32>
    %cst_24 = arith.constant dense<0.000000e+00> : vector<32x32xf32>
    %30 = tpu.matmul %28, %29, %cst_24 {dimension_numbers = #tpu.dot_dimension_numbers<[1], [0], [0], [1], [0, 0, 1, 1], [], []>} : vector<32x16xf32>, vector<16x32xf32>, vector<32x32xf32> -> vector<32x32xf32>
    %31 = vector.extract_strided_slice %12 {offsets = [192, 0], sizes = [32, 16], strides = [1, 1]} : vector<288x16xf32> to vector<32x16xf32>
    %c96 = arith.constant 96 : index
    %c0_25 = arith.constant 0 : index
    %32 = vector.load %arg3[%c96, %c0_25] : memref<144x32xf32, #tpu.memory_space<vmem>>, vector<16x32xf32>
    %cst_26 = arith.constant dense<0.000000e+00> : vector<32x32xf32>
    %33 = tpu.matmul %31, %32, %cst_26 {dimension_numbers = #tpu.dot_dimension_numbers<[1], [0], [0], [1], [0, 0, 1, 1], [], []>} : vector<32x16xf32>, vector<16x32xf32>, vector<32x32xf32> -> vector<32x32xf32>
    %34 = vector.extract_strided_slice %12 {offsets = [224, 0], sizes = [32, 16], strides = [1, 1]} : vector<288x16xf32> to vector<32x16xf32>
    %c112 = arith.constant 112 : index
    %c0_27 = arith.constant 0 : index
    %35 = vector.load %arg3[%c112, %c0_27] : memref<144x32xf32, #tpu.memory_space<vmem>>, vector<16x32xf32>
    %cst_28 = arith.constant dense<0.000000e+00> : vector<32x32xf32>
    %36 = tpu.matmul %34, %35, %cst_28 {dimension_numbers = #tpu.dot_dimension_numbers<[1], [0], [0], [1], [0, 0, 1, 1], [], []>} : vector<32x16xf32>, vector<16x32xf32>, vector<32x32xf32> -> vector<32x32xf32>
    %37 = vector.extract_strided_slice %12 {offsets = [256, 0], sizes = [32, 16], strides = [1, 1]} : vector<288x16xf32> to vector<32x16xf32>
    %c128 = arith.constant 128 : index
    %c0_29 = arith.constant 0 : index
    %38 = vector.load %arg3[%c128, %c0_29] : memref<144x32xf32, #tpu.memory_space<vmem>>, vector<16x32xf32>
    %cst_30 = arith.constant dense<0.000000e+00> : vector<32x32xf32>
    %39 = tpu.matmul %37, %38, %cst_30 {dimension_numbers = #tpu.dot_dimension_numbers<[1], [0], [0], [1], [0, 0, 1, 1], [], []>} : vector<32x16xf32>, vector<16x32xf32>, vector<32x32xf32> -> vector<32x32xf32>
    %40 = arith.addf %15, %18 : vector<32x32xf32>
    %41 = arith.addf %21, %24 : vector<32x32xf32>
    %42 = arith.addf %27, %30 : vector<32x32xf32>
    %43 = arith.addf %33, %36 : vector<32x32xf32>
    %44 = arith.addf %40, %41 : vector<32x32xf32>
    %45 = arith.addf %42, %43 : vector<32x32xf32>
    %46 = arith.addf %44, %45 : vector<32x32xf32>
    %47 = arith.addf %46, %39 : vector<32x32xf32>
    %48 = vector.broadcast %1 : vector<1x32xf32> to vector<32x32xf32>
    %49 = arith.addf %47, %48 : vector<32x32xf32>
    %cst_31 = arith.constant 0.000000e+00 : f32
    %50 = vector.broadcast %cst_31 : f32 to vector<32x32xf32>
    %51 = arith.maximumf %49, %50 : vector<32x32xf32>
    %52 = vector.extract_strided_slice %51 {offsets = [0, 0], sizes = [1, 32], strides = [1, 1]} : vector<32x32xf32> to vector<1x32xf32>
    %c0_32 = arith.constant 0 : index
    %c0_33 = arith.constant 0 : index
    %53 = vector.load %arg8[%c0_32, %c0_33] : memref<1x1024xf32, #tpu.memory_space<vmem>>, vector<1x32xf32>
    tpu.vector_store %arg8[%c0_32, %c0_33], %52 {strides = array<i32>} : memref<1x1024xf32, #tpu.memory_space<vmem>>, vector<1x32xf32>,
    %54 = vector.extract_strided_slice %51 {offsets = [1, 0], sizes = [1, 32], strides = [1, 1]} : vector<32x32xf32> to vector<1x32xf32>
    %c0_34 = arith.constant 0 : index
    %c32_35 = arith.constant 32 : index
    %55 = vector.load %arg8[%c0_34, %c32_35] : memref<1x1024xf32, #tpu.memory_space<vmem>>, vector<1x32xf32>
    tpu.vector_store %arg8[%c0_34, %c32_35], %54 {strides = array<i32>} : memref<1x1024xf32, #tpu.memory_space<vmem>>, vector<1x32xf32>,
    %56 = vector.extract_strided_slice %51 {offsets = [2, 0], sizes = [1, 32], strides = [1, 1]} : vector<32x32xf32> to vector<1x32xf32>
    %c0_36 = arith.constant 0 : index
    %c64_37 = arith.constant 64 : index
    %57 = vector.load %arg8[%c0_36, %c64_37] : memref<1x1024xf32, #tpu.memory_space<vmem>>, vector<1x32xf32>
    tpu.vector_store %arg8[%c0_36, %c64_37], %56 {strides = array<i32>} : memref<1x1024xf32, #tpu.memory_space<vmem>>, vector<1x32xf32>,
    %58 = vector.extract_strided_slice %51 {offsets = [3, 0], sizes = [1, 32], strides = [1, 1]} : vector<32x32xf32> to vector<1x32xf32>
    %c0_38 = arith.constant 0 : index
    %c96_39 = arith.constant 96 : index
    %59 = vector.load %arg8[%c0_38, %c96_39] : memref<1x1024xf32, #tpu.memory_space<vmem>>, vector<1x32xf32>
    tpu.vector_store %arg8[%c0_38, %c96_39], %58 {strides = array<i32>} : memref<1x1024xf32, #tpu.memory_space<vmem>>, vector<1x32xf32>,
    %60 = vector.extract_strided_slice %51 {offsets = [4, 0], sizes = [1, 32], strides = [1, 1]} : vector<32x32xf32> to vector<1x32xf32>
    %c0_40 = arith.constant 0 : index
    %c128_41 = arith.constant 128 : index
    %61 = vector.load %arg8[%c0_40, %c128_41] : memref<1x1024xf32, #tpu.memory_space<vmem>>, vector<1x32xf32>
    tpu.vector_store %arg8[%c0_40, %c128_41], %60 {strides = array<i32>} : memref<1x1024xf32, #tpu.memory_space<vmem>>, vector<1x32xf32>,
    %62 = vector.extract_strided_slice %51 {offsets = [5, 0], sizes = [1, 32], strides = [1, 1]} : vector<32x32xf32> to vector<1x32xf32>
    %c0_42 = arith.constant 0 : index
    %c160 = arith.constant 160 : index
    %63 = vector.load %arg8[%c0_42, %c160] : memref<1x1024xf32, #tpu.memory_space<vmem>>, vector<1x32xf32>
    tpu.vector_store %arg8[%c0_42, %c160], %62 {strides = array<i32>} : memref<1x1024xf32, #tpu.memory_space<vmem>>, vector<1x32xf32>,
    %64 = vector.extract_strided_slice %51 {offsets = [6, 0], sizes = [1, 32], strides = [1, 1]} : vector<32x32xf32> to vector<1x32xf32>
    %c0_43 = arith.constant 0 : index
    %c192 = arith.constant 192 : index
    %65 = vector.load %arg8[%c0_43, %c192] : memref<1x1024xf32, #tpu.memory_space<vmem>>, vector<1x32xf32>
    tpu.vector_store %arg8[%c0_43, %c192], %64 {strides = array<i32>} : memref<1x1024xf32, #tpu.memory_space<vmem>>, vector<1x32xf32>,
    %66 = vector.extract_strided_slice %51 {offsets = [7, 0], sizes = [1, 32], strides = [1, 1]} : vector<32x32xf32> to vector<1x32xf32>
    %c0_44 = arith.constant 0 : index
    %c224 = arith.constant 224 : index
    %67 = vector.load %arg8[%c0_44, %c224] : memref<1x1024xf32, #tpu.memory_space<vmem>>, vector<1x32xf32>
    tpu.vector_store %arg8[%c0_44, %c224], %66 {strides = array<i32>} : memref<1x1024xf32, #tpu.memory_space<vmem>>, vector<1x32xf32>,
    %68 = vector.extract_strided_slice %51 {offsets = [8, 0], sizes = [1, 32], strides = [1, 1]} : vector<32x32xf32> to vector<1x32xf32>
    %c0_45 = arith.constant 0 : index
    %c256 = arith.constant 256 : index
    %69 = vector.load %arg8[%c0_45, %c256] : memref<1x1024xf32, #tpu.memory_space<vmem>>, vector<1x32xf32>
    tpu.vector_store %arg8[%c0_45, %c256], %68 {strides = array<i32>} : memref<1x1024xf32, #tpu.memory_space<vmem>>, vector<1x32xf32>,
    %70 = vector.extract_strided_slice %51 {offsets = [9, 0], sizes = [1, 32], strides = [1, 1]} : vector<32x32xf32> to vector<1x32xf32>
    %c0_46 = arith.constant 0 : index
    %c288 = arith.constant 288 : index
    %71 = vector.load %arg8[%c0_46, %c288] : memref<1x1024xf32, #tpu.memory_space<vmem>>, vector<1x32xf32>
    tpu.vector_store %arg8[%c0_46, %c288], %70 {strides = array<i32>} : memref<1x1024xf32, #tpu.memory_space<vmem>>, vector<1x32xf32>,
    %72 = vector.extract_strided_slice %51 {offsets = [10, 0], sizes = [1, 32], strides = [1, 1]} : vector<32x32xf32> to vector<1x32xf32>
    %c0_47 = arith.constant 0 : index
    %c320 = arith.constant 320 : index
    %73 = vector.load %arg8[%c0_47, %c320] : memref<1x1024xf32, #tpu.memory_space<vmem>>, vector<1x32xf32>
    tpu.vector_store %arg8[%c0_47, %c320], %72 {strides = array<i32>} : memref<1x1024xf32, #tpu.memory_space<vmem>>, vector<1x32xf32>,
    %74 = vector.extract_strided_slice %51 {offsets = [11, 0], sizes = [1, 32], strides = [1, 1]} : vector<32x32xf32> to vector<1x32xf32>
    %c0_48 = arith.constant 0 : index
    %c352 = arith.constant 352 : index
    %75 = vector.load %arg8[%c0_48, %c352] : memref<1x1024xf32, #tpu.memory_space<vmem>>, vector<1x32xf32>
    tpu.vector_store %arg8[%c0_48, %c352], %74 {strides = array<i32>} : memref<1x1024xf32, #tpu.memory_space<vmem>>, vector<1x32xf32>,
    %76 = vector.extract_strided_slice %51 {offsets = [12, 0], sizes = [1, 32], strides = [1, 1]} : vector<32x32xf32> to vector<1x32xf32>
    %c0_49 = arith.constant 0 : index
    %c384 = arith.constant 384 : index
    %77 = vector.load %arg8[%c0_49, %c384] : memref<1x1024xf32, #tpu.memory_space<vmem>>, vector<1x32xf32>
    tpu.vector_store %arg8[%c0_49, %c384], %76 {strides = array<i32>} : memref<1x1024xf32, #tpu.memory_space<vmem>>, vector<1x32xf32>,
    %78 = vector.extract_strided_slice %51 {offsets = [13, 0], sizes = [1, 32], strides = [1, 1]} : vector<32x32xf32> to vector<1x32xf32>
    %c0_50 = arith.constant 0 : index
    %c416 = arith.constant 416 : index
    %79 = vector.load %arg8[%c0_50, %c416] : memref<1x1024xf32, #tpu.memory_space<vmem>>, vector<1x32xf32>
    tpu.vector_store %arg8[%c0_50, %c416], %78 {strides = array<i32>} : memref<1x1024xf32, #tpu.memory_space<vmem>>, vector<1x32xf32>,
    %80 = vector.extract_strided_slice %51 {offsets = [14, 0], sizes = [1, 32], strides = [1, 1]} : vector<32x32xf32> to vector<1x32xf32>
    %c0_51 = arith.constant 0 : index
    %c448 = arith.constant 448 : index
    %81 = vector.load %arg8[%c0_51, %c448] : memref<1x1024xf32, #tpu.memory_space<vmem>>, vector<1x32xf32>
    tpu.vector_store %arg8[%c0_51, %c448], %80 {strides = array<i32>} : memref<1x1024xf32, #tpu.memory_space<vmem>>, vector<1x32xf32>,
    %82 = vector.extract_strided_slice %51 {offsets = [15, 0], sizes = [1, 32], strides = [1, 1]} : vector<32x32xf32> to vector<1x32xf32>
    %c0_52 = arith.constant 0 : index
    %c480 = arith.constant 480 : index
    %83 = vector.load %arg8[%c0_52, %c480] : memref<1x1024xf32, #tpu.memory_space<vmem>>, vector<1x32xf32>
    tpu.vector_store %arg8[%c0_52, %c480], %82 {strides = array<i32>} : memref<1x1024xf32, #tpu.memory_space<vmem>>, vector<1x32xf32>,
    %84 = vector.extract_strided_slice %51 {offsets = [16, 0], sizes = [1, 32], strides = [1, 1]} : vector<32x32xf32> to vector<1x32xf32>
    %c0_53 = arith.constant 0 : index
    %c512 = arith.constant 512 : index
    %85 = vector.load %arg8[%c0_53, %c512] : memref<1x1024xf32, #tpu.memory_space<vmem>>, vector<1x32xf32>
    tpu.vector_store %arg8[%c0_53, %c512], %84 {strides = array<i32>} : memref<1x1024xf32, #tpu.memory_space<vmem>>, vector<1x32xf32>,
    %86 = vector.extract_strided_slice %51 {offsets = [17, 0], sizes = [1, 32], strides = [1, 1]} : vector<32x32xf32> to vector<1x32xf32>
    %c0_54 = arith.constant 0 : index
    %c544 = arith.constant 544 : index
    %87 = vector.load %arg8[%c0_54, %c544] : memref<1x1024xf32, #tpu.memory_space<vmem>>, vector<1x32xf32>
    tpu.vector_store %arg8[%c0_54, %c544], %86 {strides = array<i32>} : memref<1x1024xf32, #tpu.memory_space<vmem>>, vector<1x32xf32>,
    %88 = vector.extract_strided_slice %51 {offsets = [18, 0], sizes = [1, 32], strides = [1, 1]} : vector<32x32xf32> to vector<1x32xf32>
    %c0_55 = arith.constant 0 : index
    %c576 = arith.constant 576 : index
    %89 = vector.load %arg8[%c0_55, %c576] : memref<1x1024xf32, #tpu.memory_space<vmem>>, vector<1x32xf32>
    tpu.vector_store %arg8[%c0_55, %c576], %88 {strides = array<i32>} : memref<1x1024xf32, #tpu.memory_space<vmem>>, vector<1x32xf32>,
    %90 = vector.extract_strided_slice %51 {offsets = [19, 0], sizes = [1, 32], strides = [1, 1]} : vector<32x32xf32> to vector<1x32xf32>
    %c0_56 = arith.constant 0 : index
    %c608 = arith.constant 608 : index
    %91 = vector.load %arg8[%c0_56, %c608] : memref<1x1024xf32, #tpu.memory_space<vmem>>, vector<1x32xf32>
    tpu.vector_store %arg8[%c0_56, %c608], %90 {strides = array<i32>} : memref<1x1024xf32, #tpu.memory_space<vmem>>, vector<1x32xf32>,
    %92 = vector.extract_strided_slice %51 {offsets = [20, 0], sizes = [1, 32], strides = [1, 1]} : vector<32x32xf32> to vector<1x32xf32>
    %c0_57 = arith.constant 0 : index
    %c640 = arith.constant 640 : index
    %93 = vector.load %arg8[%c0_57, %c640] : memref<1x1024xf32, #tpu.memory_space<vmem>>, vector<1x32xf32>
    tpu.vector_store %arg8[%c0_57, %c640], %92 {strides = array<i32>} : memref<1x1024xf32, #tpu.memory_space<vmem>>, vector<1x32xf32>,
    %94 = vector.extract_strided_slice %51 {offsets = [21, 0], sizes = [1, 32], strides = [1, 1]} : vector<32x32xf32> to vector<1x32xf32>
    %c0_58 = arith.constant 0 : index
    %c672 = arith.constant 672 : index
    %95 = vector.load %arg8[%c0_58, %c672] : memref<1x1024xf32, #tpu.memory_space<vmem>>, vector<1x32xf32>
    tpu.vector_store %arg8[%c0_58, %c672], %94 {strides = array<i32>} : memref<1x1024xf32, #tpu.memory_space<vmem>>, vector<1x32xf32>,
    %96 = vector.extract_strided_slice %51 {offsets = [22, 0], sizes = [1, 32], strides = [1, 1]} : vector<32x32xf32> to vector<1x32xf32>
    %c0_59 = arith.constant 0 : index
    %c704 = arith.constant 704 : index
    %97 = vector.load %arg8[%c0_59, %c704] : memref<1x1024xf32, #tpu.memory_space<vmem>>, vector<1x32xf32>
    tpu.vector_store %arg8[%c0_59, %c704], %96 {strides = array<i32>} : memref<1x1024xf32, #tpu.memory_space<vmem>>, vector<1x32xf32>,
    %98 = vector.extract_strided_slice %51 {offsets = [23, 0], sizes = [1, 32], strides = [1, 1]} : vector<32x32xf32> to vector<1x32xf32>
    %c0_60 = arith.constant 0 : index
    %c736 = arith.constant 736 : index
    %99 = vector.load %arg8[%c0_60, %c736] : memref<1x1024xf32, #tpu.memory_space<vmem>>, vector<1x32xf32>
    tpu.vector_store %arg8[%c0_60, %c736], %98 {strides = array<i32>} : memref<1x1024xf32, #tpu.memory_space<vmem>>, vector<1x32xf32>,
    %100 = vector.extract_strided_slice %51 {offsets = [24, 0], sizes = [1, 32], strides = [1, 1]} : vector<32x32xf32> to vector<1x32xf32>
    %c0_61 = arith.constant 0 : index
    %c768 = arith.constant 768 : index
    %101 = vector.load %arg8[%c0_61, %c768] : memref<1x1024xf32, #tpu.memory_space<vmem>>, vector<1x32xf32>
    tpu.vector_store %arg8[%c0_61, %c768], %100 {strides = array<i32>} : memref<1x1024xf32, #tpu.memory_space<vmem>>, vector<1x32xf32>,
    %102 = vector.extract_strided_slice %51 {offsets = [25, 0], sizes = [1, 32], strides = [1, 1]} : vector<32x32xf32> to vector<1x32xf32>
    %c0_62 = arith.constant 0 : index
    %c800 = arith.constant 800 : index
    %103 = vector.load %arg8[%c0_62, %c800] : memref<1x1024xf32, #tpu.memory_space<vmem>>, vector<1x32xf32>
    tpu.vector_store %arg8[%c0_62, %c800], %102 {strides = array<i32>} : memref<1x1024xf32, #tpu.memory_space<vmem>>, vector<1x32xf32>,
    %104 = vector.extract_strided_slice %51 {offsets = [26, 0], sizes = [1, 32], strides = [1, 1]} : vector<32x32xf32> to vector<1x32xf32>
    %c0_63 = arith.constant 0 : index
    %c832 = arith.constant 832 : index
    %105 = vector.load %arg8[%c0_63, %c832] : memref<1x1024xf32, #tpu.memory_space<vmem>>, vector<1x32xf32>
    tpu.vector_store %arg8[%c0_63, %c832], %104 {strides = array<i32>} : memref<1x1024xf32, #tpu.memory_space<vmem>>, vector<1x32xf32>,
    %106 = vector.extract_strided_slice %51 {offsets = [27, 0], sizes = [1, 32], strides = [1, 1]} : vector<32x32xf32> to vector<1x32xf32>
    %c0_64 = arith.constant 0 : index
    %c864 = arith.constant 864 : index
    %107 = vector.load %arg8[%c0_64, %c864] : memref<1x1024xf32, #tpu.memory_space<vmem>>, vector<1x32xf32>
    tpu.vector_store %arg8[%c0_64, %c864], %106 {strides = array<i32>} : memref<1x1024xf32, #tpu.memory_space<vmem>>, vector<1x32xf32>,
    %108 = vector.extract_strided_slice %51 {offsets = [28, 0], sizes = [1, 32], strides = [1, 1]} : vector<32x32xf32> to vector<1x32xf32>
    %c0_65 = arith.constant 0 : index
    %c896 = arith.constant 896 : index
    %109 = vector.load %arg8[%c0_65, %c896] : memref<1x1024xf32, #tpu.memory_space<vmem>>, vector<1x32xf32>
    tpu.vector_store %arg8[%c0_65, %c896], %108 {strides = array<i32>} : memref<1x1024xf32, #tpu.memory_space<vmem>>, vector<1x32xf32>,
    %110 = vector.extract_strided_slice %51 {offsets = [29, 0], sizes = [1, 32], strides = [1, 1]} : vector<32x32xf32> to vector<1x32xf32>
    %c0_66 = arith.constant 0 : index
    %c928 = arith.constant 928 : index
    %111 = vector.load %arg8[%c0_66, %c928] : memref<1x1024xf32, #tpu.memory_space<vmem>>, vector<1x32xf32>
    tpu.vector_store %arg8[%c0_66, %c928], %110 {strides = array<i32>} : memref<1x1024xf32, #tpu.memory_space<vmem>>, vector<1x32xf32>,
    %112 = vector.extract_strided_slice %51 {offsets = [30, 0], sizes = [1, 32], strides = [1, 1]} : vector<32x32xf32> to vector<1x32xf32>
    %c0_67 = arith.constant 0 : index
    %c960 = arith.constant 960 : index
    %113 = vector.load %arg8[%c0_67, %c960] : memref<1x1024xf32, #tpu.memory_space<vmem>>, vector<1x32xf32>
    tpu.vector_store %arg8[%c0_67, %c960], %112 {strides = array<i32>} : memref<1x1024xf32, #tpu.memory_space<vmem>>, vector<1x32xf32>,
    %114 = vector.extract_strided_slice %51 {offsets = [31, 0], sizes = [1, 32], strides = [1, 1]} : vector<32x32xf32> to vector<1x32xf32>
    %c0_68 = arith.constant 0 : index
    %c992 = arith.constant 992 : index
    %115 = vector.load %arg8[%c0_68, %c992] : memref<1x1024xf32, #tpu.memory_space<vmem>>, vector<1x32xf32>
    tpu.vector_store %arg8[%c0_68, %c992], %114 {strides = array<i32>} : memref<1x1024xf32, #tpu.memory_space<vmem>>, vector<1x32xf32>,
    %c0_69 = arith.constant 0 : index
    %c0_70 = arith.constant 0 : index
    %116 = vector.load %arg8[%c0_69, %c0_70] : memref<1x1024xf32, #tpu.memory_space<vmem>>, vector<1x1024xf32>
    %c0_71 = arith.constant 0 : index
    %c0_72 = arith.constant 0 : index
    %117 = vector.load %arg4[%c0_71, %c0_72] : memref<1024x64xf32, #tpu.memory_space<vmem>>, vector<1024x64xf32>
    %cst_73 = arith.constant dense<0.000000e+00> : vector<1x64xf32>
    %118 = tpu.matmul %116, %117, %cst_73 {dimension_numbers = #tpu.dot_dimension_numbers<[1], [0], [0], [1], [0, 0, 1, 1], [], []>} : vector<1x1024xf32>, vector<1024x64xf32>, vector<1x64xf32> -> vector<1x64xf32>
    %119 = arith.addf %118, %2 : vector<1x64xf32>
    %cst_74 = arith.constant 0.000000e+00 : f32
    %120 = vector.broadcast %cst_74 : f32 to vector<1x64xf32>
    %121 = arith.maximumf %119, %120 : vector<1x64xf32>
    %c0_75 = arith.constant 0 : index
    %c0_76 = arith.constant 0 : index
    %122 = vector.load %arg5[%c0_75, %c0_76] : memref<64x8xf32, #tpu.memory_space<vmem>>, vector<64x8xf32>
    %cst_77 = arith.constant dense<0.000000e+00> : vector<1x8xf32>
    %123 = tpu.matmul %121, %122, %cst_77 {dimension_numbers = #tpu.dot_dimension_numbers<[1], [0], [0], [1], [0, 0, 1, 1], [], []>} : vector<1x64xf32>, vector<64x8xf32>, vector<1x8xf32> -> vector<1x8xf32>
    %124 = arith.addf %123, %3 : vector<1x8xf32>
    %cst_78 = arith.constant dense<0xFF800000> : vector<1xf32>
    %125 = vector.multi_reduction <maximumf>, %124, %cst_78 [1] : vector<1x8xf32> to vector<1xf32>
    %126 = vector.shape_cast %125 : vector<1xf32> to vector<1x1xf32>
    %127 = vector.broadcast %126 : vector<1x1xf32> to vector<1x8xf32>
    %128 = arith.subf %124, %127 : vector<1x8xf32>
    %129 = math.exp %128 : vector<1x8xf32>
    %cst_79 = arith.constant dense<0.000000e+00> : vector<1xf32>
    %130 = vector.multi_reduction <add>, %129, %cst_79 [1] : vector<1x8xf32> to vector<1xf32>
    %131 = vector.shape_cast %130 : vector<1xf32> to vector<1x1xf32>
    %132 = math.log %131 : vector<1x1xf32>
    %133 = vector.broadcast %132 : vector<1x1xf32> to vector<1x8xf32>
    %134 = arith.subf %128, %133 : vector<1x8xf32>
    %c0_80 = arith.constant 0 : index
    %c0_81 = arith.constant 0 : index
    %135 = vector.load %arg7[%c0_80, %c0_81] : memref<1x8xf32, #tpu.memory_space<vmem>>, vector<1x8xf32>
    tpu.vector_store %arg7[%c0_80, %c0_81], %134 {strides = array<i32>} : memref<1x8xf32, #tpu.memory_space<vmem>>, vector<1x8xf32>,
    return
  }
}

</mosaic_0001>

<bundles_post_ra>
// kernel: visual_policy_forward.1
= control target key start
LH: loop header
LB: loop body
LE: loop exit
PB: predicated region body
PF: predicated region fallthrough
CT: control target
= control target key end

     0   :  { %v3185_v3 = vmov 0.0|0.0   ;;  %vm3186_vm0 = vmmov 0   ;;  %v3187_v6 = vmov 0.0   ;;  %s4218_s0 = inlined_call_operand.vmem [shape: f32[56,48], index: 0, kind: input, shape index: {}]   ;;  %s4219_s1 = inlined_call_operand.vmem [shape: f32[288,56], index: 1, kind: input, shape index: {}]   ;;  %s4220_s2 = inlined_call_operand.vmem [shape: f32[48,16], index: 2, kind: input, shape index: {}]   ;;  %s4221_s3 = inlined_call_operand.vmem [shape: f32[144,32], index: 3, kind: input, shape index: {}]   ;;  %s4222_s4 = inlined_call_operand.vmem [shape: f32[1024,64], index: 4, kind: input, shape index: {}]   ;;  %s4223_s5 = inlined_call_operand.vmem [shape: f32[64,8], index: 5, kind: input, shape index: {}]   ;;  %s4224_s6 = inlined_call_operand.vmem [shape: f32[4,128], index: 6, kind: input, shape index: {}]   ;;  %s4225_s7 = inlined_call_operand.hbm [shape: f32[1,8], index: 7, kind: output, shape index: {}]  }
   0x1   :  { %v38_v0 = vld [vmem:[%s4220_s2] sm:$0xff]  ;;  %v39_v1 = vld [vmem:[%s4220_s2 + $0x8] sm:$0xff]  ;;  %v40_v2 = vld [vmem:[%s4220_s2 + $0x10] sm:$0xff]  ;;  %2920 = vmatprep.subr.bf16.mxu0 %v3185_v3  ;;  %2722 = vmatprep.mubr.msk.f32.mxu0 %vm3186_vm0, %v3187_v6 }
   0x2   :  { %v2921_v4 = vpack.c.bf16 %v39_v1, %v38_v0  ;;  %v41_v5 = vld [vmem:[%s4220_s2 + $0x18] sm:$0xff]  ;;  %v42_v8 = vld [vmem:[%s4220_s2 + $0x20] sm:$0xff]  ;;  %v43_v9 = vld [vmem:[%s4220_s2 + $0x28] sm:$0xff] }
   0x3   :  { %v2924_v7 = vpack.c.bf16 %v41_v5, %v40_v2 }
   0x4   :  { %2922 = vmatpush3.bf16.msra.mxu0 %v2921_v4 }
   0x5   :  { %2923 = vmatprep.subr.bf16.mxu0 %v3185_v3 }
   0x6   :  { %12 = vsyncpa [#allocation4], 0  ;;  %v2927_v10 = vpack.c.bf16 %v43_v9, %v42_v8  ;;  %v31_v11 = vld [vmem:[%s4218_s0] sm:$0xff]  ;;  %vm48_vm1 = vcmask 392192   ;;  %v32_v12 = vld [vmem:[%s4218_s0 + $0x8] sm:$0xff]  ;;  %vm213_vm2 = vcmask 457728  }
   0x7   :  { %v33_v13 = vld [vmem:[%s4218_s0 + $0x10] sm:$0xff]  ;;  %v34_v14 = vld [vmem:[%s4218_s0 + $0x18] sm:$0xff]  ;;  %v35_v15 = vld [vmem:[%s4218_s0 + $0x20] sm:$0xff]  ;;  %vm571_vm3 = vcmask 130048   ;;  %s3189_s9 = smov 64   ;;  %s3191_s11 = smov 96  }
   0x8   :  { %2925 = vmatpush3.bf16.msra.mxu0 %v2924_v7  ;;  %v36_v16 = vld [vmem:[%s4218_s0 + $0x28] sm:$0xff]  ;;  %v37_v17 = vld [vmem:[%s4218_s0 + $0x30] sm:$0xff]  ;;  %v177_v18 = vld [vmem:[%s4219_s1] sm:$0xff]  ;;  %vm2267_vm14 = vcmask 523264   ;;  %vm2341_vm15 = vcmask 57344   ;;  %s3192_s25 = smov [#allocation3]  }
   0x9   :  { %2926 = vmatprep.subr.bf16.mxu0 %v3185_v3  ;;  %2757 = vmatprep.mubr.msk.f32.mxu1 %vm213_vm2, %v177_v18  ;;  %v2369_v19 = vld [vmem:[%s4224_s6] ss:$0 sm:$0xff]  ;;  %v178_v51 = vld [vmem:[%s4219_s1 + $0x8] sm:$0xff]  ;;  %v179_v52 = vld [vmem:[%s4219_s1 + $0x10] sm:$0xff] }
   0xa   :  { %v180_v53 = vld [vmem:[%s4219_s1 + $0x18] sm:$0xff]  ;;  %v181_v54 = vld [vmem:[%s4219_s1 + $0x20] sm:$0xff]  ;;  %v182_v55 = vld [vmem:[%s4219_s1 + $0x28] sm:$0xff] }
   0xb   :  { %v183_v56 = vld [vmem:[%s4219_s1 + $0x30] sm:$0xff]  ;;  %v184_v57 = vld [vmem:[%s4219_s1 + $0x38] sm:$0xff]  ;;  %v185_v58 = vld [vmem:[%s4219_s1 + $0x40] sm:$0xff] }
   0xc   :  { %2928 = vmatpush3.bf16.msra.mxu0 %v2927_v10  ;;  %v186_v59 = vld [vmem:[%s4219_s1 + $0x48] sm:$0xff]  ;;  %v187_v60 = vld [vmem:[%s4219_s1 + $0x50] sm:$0xff]  ;;  %v188_v61 = vld [vmem:[%s4219_s1 + $0x58] sm:$0xff] }
   0xd   :  { %v189_v62 = vld [vmem:[%s4219_s1 + $0x60] sm:$0xff]  ;;  %v190_v63 = vld [vmem:[%s4219_s1 + $0x68] sm:$0xff]  ;;  %v191_v0 = vld [vmem:[%s4219_s1 + $0x70] sm:$0xff] }
   0xe   :  { %v192_v1 = vld [vmem:[%s4219_s1 + $0x78] sm:$0xff]  ;;  %v193_v2 = vld [vmem:[%s4219_s1 + $0x80] sm:$0xff]  ;;  %v194_v4 = vld [vmem:[%s4219_s1 + $0x88] sm:$0xff] }
   0xf   :  { %2723 = vmatmul.mubr.msk.f32.vlgmr.msra.gmra.mrb[0].mxu0 %vm48_vm1, %v31_v11  ;;  %v195_v5 = vld [vmem:[%s4219_s1 + $0x90] sm:$0xff]  ;;  %v196_v7 = vld [vmem:[%s4219_s1 + $0x98] sm:$0xff]  ;;  %v197_v8 = vld [vmem:[%s4219_s1 + $0xa0] sm:$0xff] }
  0x10   :  { %2725 = vmatprep.mubr.msk.f32.mxu0 %vm3186_vm0, %v3187_v6  ;;  %v198_v9 = vld [vmem:[%s4219_s1 + $0xa8] sm:$0xff]  ;;  %v199_v10 = vld [vmem:[%s4219_s1 + $0xb0] sm:$0xff]  ;;  %v200_v11 = vld [vmem:[%s4219_s1 + $0xb8] sm:$0xff] }
  0x11   :  { %v207_v18 = vld [vmem:[%s4219_s1 + $0xf0] sm:$0xff] }
  0x13   :  { %2726 = vmatmul.mubr.msk.f32.gmra.mrb[2].mxu0 %vm48_vm1, %v32_v12  ;;  %v201_v12 = vld [vmem:[%s4219_s1 + $0xc0] sm:$0xff] }
  0x14   :  { %2728 = vmatprep.mubr.msk.f32.mxu0 %vm3186_vm0, %v3187_v6 }
  0x17   :  { %2729 = vmatmul.mubr.msk.f32.gmra.mrb[4].mxu0 %vm48_vm1, %v33_v13  ;;  %v202_v13 = vld [vmem:[%s4219_s1 + $0xc8] sm:$0xff] }
  0x18   :  { %2731 = vmatprep.mubr.msk.f32.mxu0 %vm3186_vm0, %v3187_v6 }
  0x1b   :  { %2732 = vmatmul.mubr.msk.f32.gmra.mrb[6].mxu0 %vm48_vm1, %v34_v14  ;;  %v203_v14 = vld [vmem:[%s4219_s1 + $0xd0] sm:$0xff] }
  0x1c   :  { %2734 = vmatprep.mubr.msk.f32.mxu0 %vm3186_vm0, %v3187_v6 }
  0x1f   :  { %2735 = vmatmul.mubr.msk.f32.gmra.mrb[8].mxu0 %vm48_vm1, %v35_v15  ;;  %v204_v15 = vld [vmem:[%s4219_s1 + $0xd8] sm:$0xff] }
  0x20   :  { %2737 = vmatprep.mubr.msk.f32.mxu0 %vm3186_vm0, %v3187_v6 }
  0x23   :  { %2738 = vmatmul.mubr.msk.f32.gmra.mrb[10].mxu0 %vm48_vm1, %v36_v16  ;;  %v205_v16 = vld [vmem:[%s4219_s1 + $0xe0] sm:$0xff] }
  0x24   :  { %2740 = vmatprep.mubr.msk.f32.mxu0 %vm3186_vm0, %v3187_v6 }
  0x27   :  { %2741 = vmatmul.mubr.msk.f32.gmra.mrb[12].mxu0 %vm48_vm1, %v37_v17  ;;  %v206_v17 = vld [vmem:[%s4219_s1 + $0xe8] sm:$0xff] }
  0xe2   :  { %v136_v20 = vpop.f32.mrb[0].mxu0 }
  0xe3   :  { %v2724_v21 = vpop.f32.mrb[1].mxu0  ;;  %v137_v22 = vadd.f32 %v2369_v19, %v136_v20  ;;  %v209_v20 = vld [vmem:[%s4219_s1 + $0x100] sm:$0xff] }
  0xe4   :  { %v210_v21 = vld [vmem:[%s4219_s1 + $0x108] sm:$0xff] }
  0xe5   :  { %v170_v26 = vmax.f32 %v137_v22, 0.0  ;;  %v211_v22 = vld [vmem:[%s4219_s1 + $0x110] sm:$0xff] }
  0xe6   :  { %v141_v23 = vpop.f32.mrb[2].mxu0 }
  0xe7   :  { %v142_v24 = vadd.f32 %v2369_v19, %v141_v23  ;;  %v2727_v25 = vpop.f32.mrb[3].mxu0  ;;  %v212_v23 = vld [vmem:[%s4219_s1 + $0x118] sm:$0xff] }
  0xe8   :  { %v570_v25 = vld [vmem:[%s4221_s3 + $0x18] sm:$0xff] }
  0xe9   :  { %v171_v27 = vmax.f32 %v142_v24, 0.0  ;;  %v569_v24 = vld [vmem:[%s4221_s3 + $0x10] sm:$0xff] }
  0xea   :  { %v146_v28 = vpop.f32.mrb[4].mxu0 }
  0xeb   :  { %v2730_v29 = vpop.f32.mrb[5].mxu0  ;;  %v2929_v30 = vpack.c.bf16 %v171_v27, %v170_v26  ;;  %v147_v31 = vadd.f32 %v2369_v19, %v146_v28  ;;  %v2941_v26 = vpack.c.bf16 %v570_v25, %v569_v24  ;;  %v671_v27 = vld [vmem:[%s4221_s3 + $0x30] sm:$0xff]  ;;  %v672_v28 = vld [vmem:[%s4221_s3 + $0x38] sm:$0xff]  ;;  %v1825_v25 = vld [vmem:[%s4222_s4 + $0x80] sm:$0xff] }
  0xec   :  { %v2945_v29 = vpack.c.bf16 %v672_v28, %v671_v27  ;;  %v1809_v27 = vld [vmem:[%s4222_s4] sm:$0xff] }
  0xed   :  { %2930 = vmatprep.subr.bf16.mxu1 %v2929_v30  ;;  %v172_v35 = vmax.f32 %v147_v31, 0.0  ;;  %2942 = vmatprep.subr.bf16.mxu0 %v2941_v26 }
  0xee   :  { %v151_v32 = vpop.f32.mrb[6].mxu0  ;;  %2932 = vmatpush3.bf16.msra.mxu1 %v2929_v30  ;;  %2944 = vmatpush3.bf16.msra.mxu0 %v2941_v26  ;;  %v1826_v26 = vld [vmem:[%s4222_s4 + $0x88] sm:$0xff] }
  0xef   :  { %v152_v33 = vadd.f32 %v2369_v19, %v151_v32  ;;  %v2733_v34 = vpop.f32.mrb[7].mxu0  ;;  %2946 = vmatprep.subr.bf16.mxu0 %v2945_v29  ;;  %v2977_v28 = vpack.c.bf16 %v1826_v26, %v1825_v25  ;;  %v1815_v25 = vld [vmem:[%s4222_s4 + $0x30] sm:$0xff] }
  0xf0   :  { %v772_v34 = vld [vmem:[%s4221_s3 + $0x50] sm:$0xff] }
  0xf1   :  { %v173_v36 = vmax.f32 %v152_v33, 0.0 }
  0xf2   :  { %v156_v37 = vpop.f32.mrb[8].mxu0 }
  0xf3   :  { %v2933_v38 = vpack.c.bf16 %v173_v36, %v172_v35  ;;  %v2736_v39 = vpop.f32.mrb[9].mxu0  ;;  %v157_v40 = vadd.f32 %v2369_v19, %v156_v37  ;;  %v773_v35 = vld [vmem:[%s4221_s3 + $0x58] sm:$0xff] }
  0xf5   :  { %2934 = vmatprep.subr.bf16.mxu1 %v2933_v38  ;;  %v174_v44 = vmax.f32 %v157_v40, 0.0 }
  0xf6   :  { %v161_v41 = vpop.f32.mrb[10].mxu0  ;;  %2936 = vmatpush3.bf16.msra.mxu1 %v2933_v38  ;;  %v2949_v38 = vpack.c.bf16 %v773_v35, %v772_v34  ;;  %v1811_v34 = vld [vmem:[%s4222_s4 + $0x10] sm:$0xff]  ;;  %v1812_v35 = vld [vmem:[%s4222_s4 + $0x18] sm:$0xff] }
  0xf7   :  { %v162_v42 = vadd.f32 %v2369_v19, %v161_v41  ;;  %v2739_v43 = vpop.f32.mrb[11].mxu0 }
  0xf9   :  { %v175_v45 = vmax.f32 %v162_v42, 0.0 }
  0xfa   :  { %v166_v46 = vpop.f32.mrb[12].mxu0 }
  0xfb   :  { %v2937_v47 = vpack.c.bf16 %v175_v45, %v174_v44  ;;  %v167_v48 = vadd.f32 %v2369_v19, %v166_v46  ;;  %v2742_v49 = vpop.f32.mrb[13].mxu0  ;;  %v208_v19 = vld [vmem:[%s4219_s1 + $0xf8] sm:$0xff]  ;;  %v873_v45 = vld [vmem:[%s4221_s3 + $0x70] sm:$0xff] }
  0xfc   :  { %v874_v46 = vld [vmem:[%s4221_s3 + $0x78] sm:$0xff] }
  0xfd   :  { %v176_v50 = vmax.f32 %v167_v48, 0.0  ;;  %2938 = vmatprep.subr.bf16.mxu1 %v2937_v47  ;;  %v2953_v49 = vpack.c.bf16 %v874_v46, %v873_v45  ;;  %v1813_v46 = vld [vmem:[%s4222_s4 + $0x20] sm:$0xff] }
  0xfe   :  { %2940 = vmatpush3.bf16.msra.mxu1 %v2937_v47 }
  0xff   :  { %2755 = vmatprep.subr.mxu1 %v176_v50 }
 0x102   :  { %2756 = vmatpush3.msra.mxu1 %v176_v50 }
 0x103   :  { %2758 = vmatmul.mubr.msk.f32.vlgmr.msra.gmra.mrb[0].mxu1 %vm213_vm2, %v178_v51  ;;  %2978 = vmatprep.subr.bf16.mxu1 %v2977_v28 }
 0x104   :  { %2760 = vmatprep.mubr.msk.f32.mxu1 %vm213_vm2, %v179_v52 }
 0x107   :  { %2761 = vmatmul.mubr.msk.f32.gmra.mrb[2].mxu1 %vm213_vm2, %v180_v53 }
 0x108   :  { %2763 = vmatprep.mubr.msk.f32.mxu1 %vm213_vm2, %v181_v54 }
 0x10b   :  { %2764 = vmatmul.mubr.msk.f32.gmra.mrb[4].mxu1 %vm213_vm2, %v182_v55 }
 0x10c   :  { %2766 = vmatprep.mubr.msk.f32.mxu1 %vm213_vm2, %v183_v56  ;;  %v972_v56 = vld [vmem:[%s4221_s3 + $0x80] sm:$0xff] }
 0x10f   :  { %2767 = vmatmul.mubr.msk.f32.gmra.mrb[6].mxu1 %vm213_vm2, %v184_v57  ;;  %v973_v57 = vld [vmem:[%s4221_s3 + $0x88] sm:$0xff] }
 0x110   :  { %2769 = vmatprep.mubr.msk.f32.mxu1 %vm213_vm2, %v185_v58 }
 0x113   :  { %2770 = vmatmul.mubr.msk.f32.gmra.mrb[8].mxu1 %vm213_vm2, %v186_v59 }
 0x114   :  { %2772 = vmatprep.mubr.msk.f32.mxu1 %vm213_vm2, %v187_v60  ;;  %v2957_v60 = vpack.c.bf16 %v973_v57, %v972_v56 }
 0x117   :  { %2773 = vmatmul.mubr.msk.f32.gmra.mrb[10].mxu1 %vm213_vm2, %v188_v61 }
 0x118   :  { %2775 = vmatprep.mubr.msk.f32.mxu1 %vm213_vm2, %v189_v62 }
 0x11b   :  { %2776 = vmatmul.mubr.msk.f32.gmra.mrb[12].mxu1 %vm213_vm2, %v190_v63 }
 0x11c   :  { %2778 = vmatprep.mubr.msk.f32.mxu1 %vm213_vm2, %v191_v0 }
 0x11f   :  { %2779 = vmatmul.mubr.msk.f32.gmra.mrb[14].mxu1 %vm213_vm2, %v192_v1 }
 0x120   :  { %2781 = vmatprep.mubr.msk.f32.mxu1 %vm213_vm2, %v193_v2 }
 0x123   :  { %2782 = vmatmul.mubr.msk.f32.gmra.mrb[16].mxu1 %vm213_vm2, %v194_v4  ;;  %v567_v4 = vld [vmem:[%s4221_s3] sm:$0xff] }
 0x124   :  { %2784 = vmatprep.mubr.msk.f32.mxu1 %vm213_vm2, %v195_v5  ;;  %v568_v5 = vld [vmem:[%s4221_s3 + $0x8] sm:$0xff] }
 0x127   :  { %2785 = vmatmul.mubr.msk.f32.gmra.mrb[18].mxu1 %vm213_vm2, %v196_v7 }
 0x128   :  { %2787 = vmatprep.mubr.msk.f32.mxu1 %vm213_vm2, %v197_v8 }
 0x12b   :  { %2788 = vmatmul.mubr.msk.f32.gmra.mrb[20].mxu1 %vm213_vm2, %v198_v9  ;;  %v2961_v9 = vpack.c.bf16 %v568_v5, %v567_v4 }
 0x12c   :  { %2790 = vmatprep.mubr.msk.f32.mxu1 %vm213_vm2, %v199_v10 }
 0x12f   :  { %2791 = vmatmul.mubr.msk.f32.gmra.mrb[22].mxu1 %vm213_vm2, %v200_v11 }
 0x130   :  { %2793 = vmatprep.mubr.msk.f32.mxu1 %vm213_vm2, %v201_v12  ;;  %v669_v12 = vld [vmem:[%s4221_s3 + $0x20] sm:$0xff] }
 0x133   :  { %2794 = vmatmul.mubr.msk.f32.gmra.mrb[24].mxu1 %vm213_vm2, %v202_v13  ;;  %v670_v13 = vld [vmem:[%s4221_s3 + $0x28] sm:$0xff] }
 0x134   :  { %2796 = vmatprep.mubr.msk.f32.mxu1 %vm213_vm2, %v203_v14 }
 0x137   :  { %2797 = vmatmul.mubr.msk.f32.gmra.mrb[26].mxu1 %vm213_vm2, %v204_v15 }
 0x138   :  { %2799 = vmatprep.mubr.msk.f32.mxu1 %vm213_vm2, %v205_v16  ;;  %v2965_v16 = vpack.c.bf16 %v670_v13, %v669_v12 }
 0x13b   :  { %2800 = vmatmul.mubr.msk.f32.gmra.mrb[28].mxu1 %vm213_vm2, %v206_v17 }
 0x13c   :  { %2802 = vmatprep.mubr.msk.f32.mxu1 %vm213_vm2, %v207_v18 }
 0x13f   :  { %2803 = vmatmul.mubr.msk.f32.gmra.mrb[30].mxu1 %vm213_vm2, %v208_v19  ;;  %v770_v19 = vld [vmem:[%s4221_s3 + $0x40] sm:$0xff] }
 0x140   :  { %2805 = vmatprep.mubr.msk.f32.mxu1 %vm213_vm2, %v209_v20  ;;  %v771_v20 = vld [vmem:[%s4221_s3 + $0x48] sm:$0xff] }
 0x143   :  { %2806 = vmatmul.mubr.msk.f32.gmra.mrb[32].mxu1 %vm213_vm2, %v210_v21  ;;  %v2969_v21 = vpack.c.bf16 %v771_v20, %v770_v19 }
 0x144   :  { %2808 = vmatprep.mubr.msk.f32.mxu1 %vm213_vm2, %v211_v22  ;;  %v871_v22 = vld [vmem:[%s4221_s3 + $0x60] sm:$0xff] }
 0x147   :  { %2809 = vmatmul.mubr.msk.f32.gmra.mrb[34].mxu1 %vm213_vm2, %v212_v23  ;;  %v872_v23 = vld [vmem:[%s4221_s3 + $0x68] sm:$0xff]  ;;  %s3190_s3 = smov 32  }
 0x148   :  { %v2973_v24 = vpack.c.bf16 %v872_v23, %v871_v22  ;;  %v1831_v23 = vld [vmem:[%s4222_s4 + $0xb0] sm:$0xff] }
 0x1d6   :  { %v3455_v30 = vpop.f32.mrb[0].mxu1 }
 0x1d7   :  { %v3457_v31 = vpop.f32.mrb[1].mxu1 }
 0x1da   :  { %v3459_v32 = vpop.f32.mrb[2].mxu1 }
 0x1db   :  { %v3461_v33 = vpop.f32.mrb[3].mxu1 }
 0x1de   :  { %v2765_v36 = vpop.f32.mrb[4].mxu1 }
 0x1df   :  { %v408_v37 = vpop.f32.mrb[5].mxu1 }
 0x1e0   :  { %2815 = vmatprep.mubr.msk.f32.mxu0 %vm571_vm3, %v408_v37  ;;  %v1487_v37 = vlaneseq }
 0x1e1   :  { %2816 = vmatmul.mubr.msk.f32.vlgmr.msra.gmra.mrb[14].mxu0 %vm571_vm3, %v2765_v36  ;;  %v2983_v36 = vpack.c.bf16 %v1812_v35, %v1811_v34  ;;  %v1817_v35 = vld [vmem:[%s4222_s4 + $0x40] sm:$0xff] }
 0x1e2   :  { %v2768_v39 = vpop.f32.mrb[6].mxu1  ;;  %2948 = vmatpush3.bf16.msra.mxu0 %v2945_v29  ;;  %v1810_v29 = vld [vmem:[%s4222_s4 + $0x8] sm:$0xff]  ;;  %vm3615_vm4 = vcmp.lt.s32.totalorder %v1487_v37, 32  ;;  %vm1518_vm5 = vcmp.ge.s32.totalorder %v1487_v37, 32  ;;  %vm1519_vm6 = vcmp.lt.s32.totalorder %v1487_v37, 64  ;;  %vm1526_vm7 = vcmp.ge.s32.totalorder %v1487_v37, 64 }
 0x1e3   :  { %v418_v40 = vpop.f32.mrb[7].mxu1  ;;  %2950 = vmatprep.subr.bf16.mxu0 %v2949_v38  ;;  %vm1527_vm8 = vcmp.lt.s32.totalorder %v1487_v37, 96  ;;  %vm3902_vm9 = vmand %vm1518_vm5, %vm1519_vm6  ;;  %vm1534_vm11 = vcmp.ge.s32.totalorder %v1487_v37, 96  ;;  %vm1535_vm12 = vcmp.lt.s32.totalorder %v1487_v37, 128 }
 0x1e4   :  { %2818 = vmatprep.mubr.msk.f32.mxu0 %vm571_vm3, %v418_v40  ;;  %vm3906_vm10 = vmand %vm1526_vm7, %vm1527_vm8 }
 0x1e5   :  { %2819 = vmatmul.mubr.msk.f32.gmra.mrb[16].mxu0 %vm571_vm3, %v2768_v39  ;;  %vm3924_vm13 = vmand %vm1534_vm11, %vm1535_vm12 }
 0x1e6   :  { %v3473_v41 = vpop.f32.mrb[8].mxu1 }
 0x1e7   :  { %v3475_v42 = vpop.f32.mrb[9].mxu1 }
 0x1ea   :  { %v3477_v43 = vpop.f32.mrb[10].mxu1 }
 0x1eb   :  { %v3479_v44 = vpop.f32.mrb[11].mxu1 }
 0x1ee   :  { %v2777_v47 = vpop.f32.mrb[12].mxu1 }
 0x1ef   :  { %v448_v48 = vpop.f32.mrb[13].mxu1 }
 0x1f0   :  { %2825 = vmatprep.mubr.msk.f32.mxu0 %vm571_vm3, %v448_v48 }
 0x1f1   :  { %2826 = vmatmul.mubr.msk.f32.vlgmr.msra.gmra.mrb[14].mxu0 %vm571_vm3, %v2777_v47  ;;  %v1814_v47 = vld [vmem:[%s4222_s4 + $0x28] sm:$0xff] }
 0x1f2   :  { %v2780_v50 = vpop.f32.mrb[14].mxu1  ;;  %2952 = vmatpush3.bf16.msra.mxu0 %v2949_v38  ;;  %v3188_v38 = vmov 1966171168  }
 0x1f3   :  { %v458_v51 = vpop.f32.mrb[15].mxu1  ;;  %2954 = vmatprep.subr.bf16.mxu0 %v2953_v49  ;;  %v1494_v39 = vunpack.c.l.s4 %v3188_v38 }
 0x1f4   :  { %2828 = vmatprep.mubr.msk.f32.mxu0 %vm571_vm3, %v458_v51 }
 0x1f5   :  { %2829 = vmatmul.mubr.msk.f32.gmra.mrb[16].mxu0 %vm571_vm3, %v2780_v50  ;;  %v1495_v40 = vunpack.c.0.s8 %v1494_v39 }
 0x1f6   :  { %v3491_v52 = vpop.f32.mrb[16].mxu1 }
 0x1f7   :  { %v3493_v53 = vpop.f32.mrb[17].mxu1 }
 0x1fa   :  { %v3495_v54 = vpop.f32.mrb[18].mxu1 }
 0x1fb   :  { %v3497_v55 = vpop.f32.mrb[19].mxu1 }
 0x1fe   :  { %v2789_v58 = vpop.f32.mrb[20].mxu1 }
 0x1ff   :  { %v488_v59 = vpop.f32.mrb[21].mxu1 }
 0x200   :  { %2835 = vmatprep.mubr.msk.f32.mxu0 %vm571_vm3, %v488_v59 }
 0x201   :  { %2836 = vmatmul.mubr.msk.f32.vlgmr.msra.gmra.mrb[14].mxu0 %vm571_vm3, %v2789_v58 }
 0x202   :  { %v2792_v61 = vpop.f32.mrb[22].mxu1  ;;  %2956 = vmatpush3.bf16.msra.mxu0 %v2953_v49  ;;  %v2987_v49 = vpack.c.bf16 %v1814_v47, %v1813_v46  ;;  %v1873_v46 = vld [vmem:[%s4222_s4 + $0x200] sm:$0xff]  ;;  %v1874_v47 = vld [vmem:[%s4222_s4 + $0x208] sm:$0xff] }
 0x203   :  { %v498_v62 = vpop.f32.mrb[23].mxu1  ;;  %2958 = vmatprep.subr.bf16.mxu0 %v2957_v60 }
 0x204   :  { %2838 = vmatprep.mubr.msk.f32.mxu0 %vm571_vm3, %v498_v62 }
 0x205   :  { %2839 = vmatmul.mubr.msk.f32.gmra.mrb[16].mxu0 %vm571_vm3, %v2792_v61 }
 0x206   :  { %v2795_v63 = vpop.f32.mrb[24].mxu1 }
 0x207   :  { %v508_v0 = vpop.f32.mrb[25].mxu1 }
 0x20a   :  { %v2798_v1 = vpop.f32.mrb[26].mxu1 }
 0x20b   :  { %v518_v2 = vpop.f32.mrb[27].mxu1 }
 0x20e   :  { %v2801_v7 = vpop.f32.mrb[28].mxu1 }
 0x20f   :  { %v528_v8 = vpop.f32.mrb[29].mxu1 }
 0x210   :  { %2845 = vmatprep.mubr.msk.f32.mxu0 %vm571_vm3, %v528_v8 }
 0x211   :  { %2846 = vmatmul.mubr.msk.f32.vlgmr.msra.gmra.mrb[14].mxu0 %vm571_vm3, %v2801_v7 }
 0x212   :  { %2960 = vmatpush3.bf16.msra.mxu0 %v2957_v60  ;;  %v2804_v10 = vpop.f32.mrb[30].mxu1 }
 0x213   :  { %v538_v11 = vpop.f32.mrb[31].mxu1  ;;  %2962 = vmatprep.subr.bf16.mxu0 %v2961_v9 }
 0x214   :  { %2848 = vmatprep.mubr.msk.f32.mxu0 %vm571_vm3, %v538_v11 }
 0x215   :  { %2849 = vmatmul.mubr.msk.f32.gmra.mrb[16].mxu0 %vm571_vm3, %v2804_v10 }
 0x216   :  { %v2807_v14 = vpop.f32.mrb[32].mxu1 }
 0x217   :  { %v548_v15 = vpop.f32.mrb[33].mxu1 }
 0x218   :  { %2855 = vmatprep.mubr.msk.f32.mxu0 %vm571_vm3, %v548_v15 }
 0x219   :  { %2856 = vmatmul.mubr.msk.f32.vlgmr.msra.gmra.mrb[14].mxu0 %vm571_vm3, %v2807_v14 }
 0x21a   :  { %2964 = vmatpush3.bf16.msra.mxu0 %v2961_v9  ;;  %v2810_v17 = vpop.f32.mrb[34].mxu1 }
 0x21b   :  { %v558_v18 = vpop.f32.mrb[35].mxu1  ;;  %2966 = vmatprep.subr.bf16.mxu0 %v2965_v16 }
 0x21c   :  { %2858 = vmatprep.mubr.msk.f32.mxu0 %vm571_vm3, %v558_v18 }
 0x21d   :  { %2859 = vmatmul.mubr.msk.f32.gmra.mrb[16].mxu0 %vm571_vm3, %v2810_v17 }
 0x21e   :  { %2865 = vmatprep.mubr.msk.f32.mxu0 %vm571_vm3, %v3457_v31  ;;  %v1828_v31 = vld [vmem:[%s4222_s4 + $0x98] sm:$0xff] }
 0x221   :  { %2866 = vmatmul.mubr.msk.f32.vlgmr.msra.gmra.mrb[14].mxu0 %vm571_vm3, %v3455_v30  ;;  %v1827_v30 = vld [vmem:[%s4222_s4 + $0x90] sm:$0xff] }
 0x222   :  { %2968 = vmatpush3.bf16.msra.mxu0 %v2965_v16  ;;  %2868 = vmatprep.mubr.msk.f32.mxu0 %vm571_vm3, %v3461_v33  ;;  %v2981_v33 = vpack.c.bf16 %v1828_v31, %v1827_v30  ;;  %v1833_v30 = vld [vmem:[%s4222_s4 + $0xc0] sm:$0xff]  ;;  %v1834_v31 = vld [vmem:[%s4222_s4 + $0xc8] sm:$0xff] }
 0x223   :  { %2970 = vmatprep.subr.bf16.mxu0 %v2969_v21  ;;  %v2993_v39 = vpack.c.bf16 %v1834_v31, %v1833_v30 }
 0x225   :  { %2869 = vmatmul.mubr.msk.f32.gmra.mrb[16].mxu0 %vm571_vm3, %v3459_v32  ;;  %v2979_v32 = vpack.c.bf16 %v1810_v29, %v1809_v27  ;;  %v1816_v29 = vld [vmem:[%s4222_s4 + $0x38] sm:$0xff] }
 0x226   :  { %2875 = vmatprep.mubr.msk.f32.mxu0 %vm571_vm3, %v3475_v42  ;;  %v2449_v42 = vld [vmem:[%s4224_s6 + $0x1] ss:$0 sm:$0xff]  ;;  %v2991_v38 = vpack.c.bf16 %v1816_v29, %v1815_v25 }
 0x227   :  { %2980 = vmatpush3.bf16.msra.mxu1 %v2979_v32  ;;  %v1889_v32 = vld [vmem:[%s4222_s4 + $0x280] sm:$0xff] }
 0x228   :  { %2982 = vmatprep.subr.bf16.mxu1 %v2981_v33  ;;  %v1890_v33 = vld [vmem:[%s4222_s4 + $0x288] sm:$0xff] }
 0x229   :  { %2876 = vmatmul.mubr.msk.f32.vlgmr.msra.gmra.mrb[14].mxu0 %vm571_vm3, %v3473_v41  ;;  %v3594_v41 = vshrl.u32 %v1487_v37, 7 }
 0x22a   :  { %2972 = vmatpush3.bf16.msra.mxu0 %v2969_v21  ;;  %2878 = vmatprep.mubr.msk.f32.mxu0 %vm571_vm3, %v3479_v44  ;;  %v1830_v44 = vld [vmem:[%s4222_s4 + $0xa8] sm:$0xff] }
 0x22b   :  { %2974 = vmatprep.subr.bf16.mxu0 %v2973_v24  ;;  %2984 = vmatpush3.bf16.msra.mxu1 %v2983_v36  ;;  %v3612_v51 = vsub.s32 %v1495_v40, %v3594_v41  ;;  %v1818_v36 = vld [vmem:[%s4222_s4 + $0x48] sm:$0xff] }
 0x22d   :  { %2879 = vmatmul.mubr.msk.f32.gmra.mrb[16].mxu0 %vm571_vm3, %v3477_v43  ;;  %v1829_v43 = vld [vmem:[%s4222_s4 + $0xa0] sm:$0xff] }
 0x22e   :  { %2885 = vmatprep.mubr.msk.f32.mxu0 %vm571_vm3, %v3493_v53  ;;  %v2985_v45 = vpack.c.bf16 %v1830_v44, %v1829_v43  ;;  %v3041_v44 = vpack.c.bf16 %v1890_v33, %v1889_v32  ;;  %v1822_v32 = vld [vmem:[%s4222_s4 + $0x68] sm:$0xff]  ;;  %v1897_v33 = vld [vmem:[%s4222_s4 + $0x2c0] sm:$0xff] }
 0x230   :  { %2986 = vmatprep.subr.bf16.mxu1 %v2985_v45  ;;  %v2995_v45 = vpack.c.bf16 %v1818_v36, %v1817_v35 }
 0x231   :  { %2886 = vmatmul.mubr.msk.f32.vlgmr.msra.gmra.mrb[14].mxu0 %vm571_vm3, %v3491_v52  ;;  %2988 = vmatpush3.bf16.msra.mxu1 %v2987_v49  ;;  %v3043_v49 = vpack.c.bf16 %v1874_v47, %v1873_v46 }
 0x232   :  { %2976 = vmatpush3.bf16.msra.mxu0 %v2973_v24  ;;  %2888 = vmatprep.mubr.msk.f32.mxu0 %vm571_vm3, %v3497_v55  ;;  %v1832_v24 = vld [vmem:[%s4222_s4 + $0xb8] sm:$0xff] }
 0x233   :  { %v2989_v34 = vpack.c.bf16 %v1832_v24, %v1831_v23  ;;  %3042 = vmatprep.subr.bf16.mxu0 %v3041_v44  ;;  %v1837_v23 = vld [vmem:[%s4222_s4 + $0xe0] sm:$0xff]  ;;  %v1838_v24 = vld [vmem:[%s4222_s4 + $0xe8] sm:$0xff] }
 0x234   :  { %v3001_v25 = vpack.c.bf16 %v1838_v24, %v1837_v23 }
 0x235   :  { %2889 = vmatmul.mubr.msk.f32.gmra.mrb[16].mxu0 %vm571_vm3, %v3495_v54  ;;  %2990 = vmatprep.subr.bf16.mxu1 %v2989_v34  ;;  %v1892_v54 = vld [vmem:[%s4222_s4 + $0x298] sm:$0xff]  ;;  %v1898_v34 = vld [vmem:[%s4222_s4 + $0x2c8] sm:$0xff] }
 0x236   :  { %2895 = vmatprep.mubr.msk.f32.mxu0 %vm571_vm3, %v508_v0  ;;  %2992 = vmatpush3.bf16.msra.mxu1 %v2991_v38  ;;  %v3057_v38 = vpack.c.bf16 %v1898_v34, %v1897_v33 }
 0x237   :  { %2994 = vmatprep.subr.bf16.mxu1 %v2993_v39  ;;  %v1882_v39 = vld [vmem:[%s4222_s4 + $0x248] sm:$0xff] }
 0x239   :  { %2896 = vmatmul.mubr.msk.f32.vlgmr.msra.gmra.mrb[14].mxu0 %vm571_vm3, %v2795_v63 }
 0x23a   :  { %2898 = vmatprep.mubr.msk.f32.mxu0 %vm571_vm3, %v518_v2  ;;  %3044 = vmatpush3.bf16.msra.mxu0 %v3043_v49  ;;  %v1884_v49 = vld [vmem:[%s4222_s4 + $0x258] sm:$0xff] }
 0x23b   :  { %2996 = vmatpush3.bf16.msra.mxu1 %v2995_v45 }
 0x23d   :  { %2899 = vmatmul.mubr.msk.f32.gmra.mrb[16].mxu0 %vm571_vm3, %v2798_v1 }
 0x30c   :  { %v2897_v48 = vpop.f32.mrb[14].mxu0 }
 0x30d   :  { %v1480_v50 = vadd.f32 %v2897_v48, %v2449_v42  ;;  %v1440_v52 = vpop.f32.mrb[15].mxu0  ;;  %v1835_v48 = vld [vmem:[%s4222_s4 + $0xd0] sm:$0xff] }
 0x30e   :  { %v1479_v53 = vadd.f32 %v2449_v42, %v1440_v52  ;;  %v1891_v52 = vld [vmem:[%s4222_s4 + $0x290] sm:$0xff] }
 0x30f   :  { %v1484_v55 = vmax.f32 %v1480_v50, 0.0  ;;  %v1836_v50 = vld [vmem:[%s4222_s4 + $0xd8] sm:$0xff] }
 0x310   :  { %v1483_v56 = vmax.f32 %v1479_v53, 0.0  ;;  %v2900_v57 = vpop.f32.mrb[16].mxu0  ;;  %v2997_v53 = vpack.c.bf16 %v1836_v50, %v1835_v48  ;;  %v1883_v48 = vld [vmem:[%s4222_s4 + $0x250] sm:$0xff] }
 0x311   :  { %v1615_v58 = vcombine.high %v1484_v55, %v1484_v55  ;;  %v1482_v59 = vadd.f32 %v2900_v57, %v2449_v42  ;;  %v1450_v60 = vpop.f32.mrb[17].mxu0  ;;  %v1585_v61 = vrot.slane %v1484_v55, %v3612_v51  ;;  %1577 = vst.msk [vmem:[#allocation2 + $0x2] sm:$0x1] %vm3615_vm4, %v1484_v55  ;;  %v1839_v50 = vld [vmem:[%s4222_s4 + $0xf0] sm:$0xff] }
 0x312   :  { %v1499_v62 = vrot.slane %v1483_v56, %v3612_v51  ;;  %v1538_v63 = vcombine.high %v1483_v56, %v1483_v56  ;;  %v1481_v0 = vadd.f32 %v2449_v42, %v1450_v60  ;;  %1491 = vst.msk [vmem:[#allocation2] sm:$0x1] %vm3615_vm4, %v1483_v56  ;;  %v1820_v60 = vld [vmem:[%s4222_s4 + $0x58] sm:$0xff]  ;;  %2998 = vmatprep.subr.bf16.mxu1 %v2997_v53  ;;  %v1823_v53 = vld [vmem:[%s4222_s4 + $0x70] sm:$0xff] }
 0x313   :  { %v1622_v1 = vrot.slane %v1615_v58, %v3612_v51  ;;  %v3626_v2 = vmax.f32 %v1482_v59, 0.0  ;;  %v1593_v4 = vrot.slane %v1585_v61, %v3612_v51  ;;  %v1586_v5 = vcombine.high %v1585_v61, %v1585_v61  ;;  %v1819_v59 = vld [vmem:[%s4222_s4 + $0x50] sm:$0xff] }
 0x314   :  { %v3630_v7 = vrot.slane %v1538_v63, %v3612_v51  ;;  %v3632_v8 = vmax.f32 %v1481_v0, 0.0  ;;  %v1500_v12 = vcombine.high %v1499_v62, %v1499_v62  ;;  %v1507_v21 = vrot.slane %v1499_v62, %v3612_v51  ;;  %v1875_v61 = vld [vmem:[%s4222_s4 + $0x210] sm:$0xff]  ;;  %v1876_v63 = vld [vmem:[%s4222_s4 + $0x218] sm:$0xff]  ;;  %v1893_v0 = vld [vmem:[%s4222_s4 + $0x2a0] sm:$0xff] }
 0x315   :  { %v1769_v9 = vcombine.high %v3626_v2, %v3626_v2  ;;  %v1605_v10 = vcombine.high %v1593_v4, %v1593_v4  ;;  %v1600_v11 = vrot.slane %v1586_v5, %v3612_v51  ;;  %1731 = vst.msk [vmem:[#allocation2 + $0x6] sm:$0x1] %vm3615_vm4, %v3626_v2  ;;  %v1632_v14 = vcombine.high %v1622_v1, %v1622_v1  ;;  %v1894_v4 = vld [vmem:[%s4222_s4 + $0x2a8] sm:$0xff] }
 0x316   :  { %v1692_v13 = vcombine.high %v3632_v8, %v3632_v8  ;;  %1654 = vst.msk [vmem:[#allocation2 + $0x4] sm:$0x1] %vm3615_vm4, %v3632_v8  ;;  %v1629_v16 = vrot.slane %v1622_v1, %v3612_v51  ;;  %v1552_v17 = vrot.slane %v3630_v7, %v3612_v51  ;;  %v3658_v20 = vrot.slane %v1500_v12, %v3612_v51  ;;  %v1878_v12 = vld [vmem:[%s4222_s4 + $0x228] sm:$0xff] }
 0x317   :  { %v3646_v15 = vrot.slane %v1769_v9, %v3612_v51  ;;  %1606 = vrot.lane.b32.xlu0 %v1605_v10, %s3189_s9  ;;  %1601 = vrot.lane.b32.xlu1 %v1600_v11, %s3190_s3  ;;  %v1639_v19 = vrot.slane %v1632_v14, %v3612_v51  ;;  %v1522_v27 = vcombine.high %v1507_v21, %v1507_v21 }
 0x318   :  { %v3654_v18 = vrot.slane %v1692_v13, %v3612_v51  ;;  %1631 = vst.msk [vmem:[#allocation2 + $0x3] sm:$0x1] %vm3615_vm4, %v1629_v16  ;;  %1554 = vst.msk [vmem:[#allocation2 + $0x1] sm:$0x1] %vm3615_vm4, %v1552_v17  ;;  %v1644_v26 = vcombine.high %v1629_v16, %v1629_v16  ;;  %v1610_v40 = vcombine.high %v1600_v11, %v1600_v11  ;;  %v1877_v11 = vld [vmem:[%s4222_s4 + $0x220] sm:$0xff]  ;;  %v1895_v13 = vld [vmem:[%s4222_s4 + $0x2b0] sm:$0xff] }
 0x319   :  { %v3665_v22 = vrot.slane %v3646_v15, %v3612_v51  ;;  %v1567_v42 = vcombine.high %v1552_v17, %v1552_v17  ;;  %v1555_v43 = vcombine.high %v3630_v7, %v3630_v7  ;;  %v1739_v55 = vrot.slane %v3626_v2, %v3612_v51 }
 0x31a   :  { %v3686_v28 = vrot.slane %v3654_v18, %v3612_v51  ;;  %v1649_v56 = vcombine.high %v1639_v19, %v1639_v19  ;;  %v3045_v58 = vpack.c.bf16 %v1892_v54, %v1891_v52  ;;  %v2999_v62 = vpack.c.bf16 %v1820_v60, %v1819_v59 }
 0x31b   :  { %1640 = vrot.lane.b32.xlu1 %v1639_v19, %s3190_s3  ;;  %1515 = vrot.lane.b32.xlu0 %v3658_v20, %s3190_s3  ;;  %1785 = vst.msk [vmem:[#allocation2 + $0x7] sm:$0x1] %vm3615_vm4, %v3665_v22  ;;  %v1562_v57 = vrot.slane %v1555_v43, %v3612_v51  ;;  %v1530_v1 = vcombine.high %v3658_v20, %v3658_v20  ;;  %v1900_v43 = vld [vmem:[%s4222_s4 + $0x2d8] sm:$0xff] }
 0x31c   :  { %1708 = vst.msk [vmem:[#allocation2 + $0x5] sm:$0x1] %vm3615_vm4, %v3686_v28  ;;  %3046 = vmatprep.subr.bf16.mxu0 %v3045_v58  ;;  %v3047_v2 = vpack.c.bf16 %v1876_v63, %v1875_v61  ;;  %v1786_v7 = vcombine.high %v3646_v15, %v3646_v15  ;;  %v1740_v9 = vcombine.high %v1739_v55, %v1739_v55  ;;  %v1896_v15 = vld [vmem:[%s4222_s4 + $0x2b8] sm:$0xff]  ;;  %v1886_v63 = vld [vmem:[%s4222_s4 + $0x268] sm:$0xff] }
 0x31d   :  { %v1572_v5 = vcombine.high %v1562_v57, %v1562_v57  ;;  %v3049_v10 = vpack.c.bf16 %v1894_v4, %v1893_v0  ;;  %3000 = vmatpush3.bf16.msra.mxu1 %v2999_v62  ;;  %v3051_v14 = vpack.c.bf16 %v1878_v12, %v1877_v11  ;;  %v3053_v16 = vpack.c.bf16 %v1896_v15, %v1895_v13  ;;  %v1885_v62 = vld [vmem:[%s4222_s4 + $0x260] sm:$0xff]  ;;  %v1903_v0 = vld [vmem:[%s4222_s4 + $0x2f0] sm:$0xff]  ;;  %v1888_v4 = vld [vmem:[%s4222_s4 + $0x278] sm:$0xff] }
 0x31e   :  { %3048 = vmatpush3.bf16.msra.mxu0 %v3047_v2  ;;  %v1662_v17 = vrot.slane %v3632_v8, %v3612_v51  ;;  %v3780_v19 = vrot.slane %v1786_v7, %v3612_v51  ;;  %v3783_v20 = vrot.slane %v1740_v9, %v3612_v51  ;;  %v1747_v21 = vrot.slane %v1739_v55, %v3612_v51  ;;  %v1879_v8 = vld [vmem:[%s4222_s4 + $0x230] sm:$0xff]  ;;  %v1824_v55 = vld [vmem:[%s4222_s4 + $0x78] sm:$0xff]  ;;  %v1857_v11 = vld [vmem:[%s4222_s4 + $0x180] sm:$0xff] }
 0x31f   :  { %1645 = vrot.lane.b32.xlu1 %v1644_v26, %s3189_s9  ;;  %1523 = vrot.lane.b32.xlu0 %v1522_v27, %s3189_s9  ;;  %v1880_v26 = vld [vmem:[%s4222_s4 + $0x238] sm:$0xff]  ;;  %v1821_v27 = vld [vmem:[%s4222_s4 + $0x60] sm:$0xff]  ;;  %v1798_v29 = vcombine.high %v3665_v22, %v3665_v22  ;;  %v1709_v30 = vcombine.high %v3654_v18, %v3654_v18  ;;  %v3063_v52 = vpack.c.bf16 %v1884_v49, %v1883_v48  ;;  %v1956_v49 = vsub.s32 4, %v3594_v41 }
 0x320   :  { %3050 = vmatprep.subr.bf16.mxu0 %v3049_v10  ;;  %v3055_v31 = vpack.c.bf16 %v1880_v26, %v1879_v8  ;;  %v1759_v35 = vcombine.high %v1747_v21, %v1747_v21  ;;  %v1663_v36 = vcombine.high %v1662_v17, %v1662_v17  ;;  %3002 = vmatprep.subr.bf16.mxu1 %v3001_v25  ;;  %v1881_v18 = vld [vmem:[%s4222_s4 + $0x240] sm:$0xff]  ;;  %v1887_v2 = vld [vmem:[%s4222_s4 + $0x270] sm:$0xff]  ;;  %v1858_v12 = vld [vmem:[%s4222_s4 + $0x188] sm:$0xff] }
 0x321   :  { %v3003_v22 = vpack.c.bf16 %v1822_v32, %v1821_v27  ;;  %v1716_v45 = vrot.slane %v1709_v30, %v3612_v51  ;;  %v1670_v47 = vrot.slane %v1662_v17, %v3612_v51  ;;  %v1721_v58 = vcombine.high %v3686_v28, %v3686_v28  ;;  %v1904_v28 = vld [vmem:[%s4222_s4 + $0x2f8] sm:$0xff]  ;;  %v1842_v48 = vld [vmem:[%s4222_s4 + $0x108] sm:$0xff]  ;;  %v1869_v25 = vld [vmem:[%s4222_s4 + $0x1e0] sm:$0xff] }
 0x322   :  { %3052 = vmatpush3.bf16.msra.mxu0 %v3051_v14  ;;  %v1677_v46 = vrot.slane %v1663_v36, %v3612_v51  ;;  %v1840_v51 = vld [vmem:[%s4222_s4 + $0xf8] sm:$0xff]  ;;  %v3007_v60 = vpack.c.bf16 %v1824_v55, %v1823_v53  ;;  %v3071_v10 = vpack.c.bf16 %v1888_v4, %v1887_v2  ;;  %v1803_v13 = vcombine.high %v3780_v19, %v3780_v19  ;;  %v1845_v2 = vld [vmem:[%s4222_s4 + $0x120] sm:$0xff]  ;;  %v1846_v4 = vld [vmem:[%s4222_s4 + $0x128] sm:$0xff] }
 0x323   :  { %1568 = vrot.lane.b32.xlu1 %v1567_v42, %s3189_s9  ;;  %1611 = vrot.lane.b32.xlu0 %v1610_v40, %s3191_s11  ;;  %v1899_v40 = vld [vmem:[%s4222_s4 + $0x2d0] sm:$0xff]  ;;  %v3059_v42 = vpack.c.bf16 %v1882_v39, %v1881_v18  ;;  %v3005_v54 = vpack.c.bf16 %v1840_v51, %v1839_v50  ;;  %v1682_v59 = vcombine.high %v1670_v47, %v1670_v47  ;;  %v1841_v47 = vld [vmem:[%s4222_s4 + $0x100] sm:$0xff]  ;;  %v1952_v50 = vsub.s32 3, %v3594_v41 }
 0x324   :  { %3054 = vmatprep.subr.bf16.mxu0 %v3053_v16  ;;  %3004 = vmatpush3.bf16.msra.mxu1 %v3003_v22  ;;  %v3061_v44 = vpack.c.bf16 %v1900_v43, %v1899_v40  ;;  %v1726_v7 = vcombine.high %v1716_v45, %v1716_v45  ;;  %v1687_v9 = vcombine.high %v1677_v46, %v1677_v46  ;;  %v1860_v51 = vld [vmem:[%s4222_s4 + $0x198] sm:$0xff]  ;;  %v1849_v16 = vld [vmem:[%s4222_s4 + $0x140] sm:$0xff]  ;;  %v1850_v17 = vld [vmem:[%s4222_s4 + $0x148] sm:$0xff] }
 0x325   :  { %3006 = vmatprep.subr.bf16.mxu1 %v3005_v54  ;;  %v1764_v14 = vcombine.high %v3783_v20, %v3783_v20  ;;  %v3009_v15 = vpack.c.bf16 %v1858_v12, %v1857_v11  ;;  %v3011_v54 = vpack.c.bf16 %v1842_v48, %v1841_v47  ;;  %v1847_v11 = vld [vmem:[%s4222_s4 + $0x130] sm:$0xff]  ;;  %v1865_v12 = vld [vmem:[%s4222_s4 + $0x1c0] sm:$0xff] }
 0x326   :  { %3056 = vmatpush3.bf16.msra.mxu0 %v3055_v31 }
 0x327   :  { %1650 = vrot.lane.b32.xlu1 %v1649_v56, %s3191_s11  ;;  %1563 = vrot.lane.b32.xlu0 %v1562_v57, %s3190_s3  ;;  %v1901_v56 = vld [vmem:[%s4222_s4 + $0x2e0] sm:$0xff]  ;;  %v1902_v57 = vld [vmem:[%s4222_s4 + $0x2e8] sm:$0xff] }
 0x328   :  { %3058 = vmatprep.subr.bf16.mxu0 %v3057_v38  ;;  %v3065_v61 = vpack.c.bf16 %v1902_v57, %v1901_v56  ;;  %3008 = vmatpush3.bf16.msra.mxu1 %v3007_v60  ;;  %v1843_v60 = vld [vmem:[%s4222_s4 + $0x110] sm:$0xff] }
 0x329   :  { %3010 = vmatprep.subr.bf16.mxu1 %v3009_v15 }
 0x32a   :  { %3060 = vmatpush3.bf16.msra.mxu0 %v3059_v42 }
 0x32b   :  { %1573 = vrot.lane.b32.xlu1 %v1572_v5, %s3191_s11  ;;  %1531 = vrot.lane.b32.xlu0 %v1530_v1, %s3191_s11  ;;  %v3067_v1 = vpack.c.bf16 %v1886_v63, %v1885_v62  ;;  %v3069_v5 = vpack.c.bf16 %v1904_v28, %v1903_v0  ;;  %v1861_v63 = vld [vmem:[%s4222_s4 + $0x1a0] sm:$0xff]  ;;  %v1862_v0 = vld [vmem:[%s4222_s4 + $0x1a8] sm:$0xff] }
 0x32c   :  { %3062 = vmatprep.subr.bf16.mxu0 %v3061_v44  ;;  %v1944_v44 = vsub.s32 1, %v3594_v41  ;;  %v3017_v28 = vpack.c.bf16 %v1862_v0, %v1861_v63  ;;  %v1911_v0 = vld [vmem:[%s4222_s4 + $0x330] sm:$0xff] }
 0x32e   :  { %3064 = vmatpush3.bf16.msra.mxu0 %v3063_v52  ;;  %v1859_v52 = vld [vmem:[%s4222_s4 + $0x190] sm:$0xff] }
 0x32f   :  { %1794 = vrot.lane.b32.xlu1 %v3780_v19, %s3190_s3  ;;  %1755 = vrot.lane.b32.xlu0 %v3783_v20, %s3190_s3 }
 0x330   :  { %3066 = vmatprep.subr.bf16.mxu0 %v3065_v61  ;;  %v1844_v61 = vld [vmem:[%s4222_s4 + $0x118] sm:$0xff] }
 0x332   :  { %3068 = vmatpush3.bf16.msra.mxu0 %v3067_v1  ;;  %v3015_v1 = vpack.c.bf16 %v1844_v61, %v1843_v60  ;;  %v1927_v60 = vld [vmem:[%s4222_s4 + $0x3b0] sm:$0xff]  ;;  %v1928_v61 = vld [vmem:[%s4222_s4 + $0x3b8] sm:$0xff] }
 0x333   :  { %1799 = vrot.lane.b32.xlu1 %v1798_v29, %s3189_s9  ;;  %1760 = vrot.lane.b32.xlu0 %v1759_v35, %s3189_s9  ;;  %v3085_v63 = vpack.c.bf16 %v1928_v61, %v1927_v60 }
 0x334   :  { %3070 = vmatprep.subr.bf16.mxu0 %v3069_v5  ;;  %v1863_v5 = vld [vmem:[%s4222_s4 + $0x1b0] sm:$0xff] }
 0x336   :  { %3072 = vmatpush3.bf16.msra.mxu0 %v3071_v10 }
 0x337   :  { %1717 = vrot.lane.b32.xlu1 %v1716_v45, %s3190_s3  ;;  %1678 = vrot.lane.b32.xlu0 %v1677_v46, %s3190_s3  ;;  %v1960_v45 = vsub.s32 5, %v3594_v41  ;;  %v1940_v46 = vsub.s32 0, %v3594_v41 }
 0x338   :  { %3105 = vmatprep.subr.bf16.mxu0 %v3185_v3 }
 0x33b   :  { %1722 = vrot.lane.b32.xlu1 %v1721_v58, %s3189_s9  ;;  %1683 = vrot.lane.b32.xlu0 %v1682_v59, %s3189_s9  ;;  %v3013_v59 = vpack.c.bf16 %v1860_v51, %v1859_v52  ;;  %v1908_v52 = vld [vmem:[%s4222_s4 + $0x318] sm:$0xff] }
 0x33f   :  { %1727 = vrot.lane.b32.xlu1 %v1726_v7, %s3191_s11  ;;  %1688 = vrot.lane.b32.xlu0 %v1687_v9, %s3191_s11  ;;  %v1864_v7 = vld [vmem:[%s4222_s4 + $0x1b8] sm:$0xff]  ;;  %v3019_v9 = vpack.c.bf16 %v1846_v4, %v1845_v2  ;;  %v1930_v2 = vld [vmem:[%s4222_s4 + $0x3c8] sm:$0xff] }
 0x340   :  { %v3021_v10 = vpack.c.bf16 %v1864_v7, %v1863_v5  ;;  %v1913_v7 = vld [vmem:[%s4222_s4 + $0x340] sm:$0xff] }
 0x343   :  { %1804 = vrot.lane.b32.xlu1 %v1803_v13, %s3191_s11  ;;  %1765 = vrot.lane.b32.xlu0 %v1764_v14, %s3191_s11  ;;  %v1866_v13 = vld [vmem:[%s4222_s4 + $0x1c8] sm:$0xff] }
 0x344   :  { %v3025_v15 = vpack.c.bf16 %v1866_v13, %v1865_v12  ;;  %v1915_v13 = vld [vmem:[%s4222_s4 + $0x350] sm:$0xff] }
 0x389   :  { %v1607_v19 = vpop.permute.xlu0 %1606  ;;  %v1602_v20 = vpop.permute.xlu1 %1601 }
 0x38a   :  { %1604 = vst.msk [vmem:[#allocation2 + $0x2] sm:$0x1] %vm3902_vm9, %v1602_v20  ;;  %v1868_v20 = vld [vmem:[%s4222_s4 + $0x1d8] sm:$0xff] }
 0x38b   :  { %1609 = vst.msk [vmem:[#allocation2 + $0x2] sm:$0x1] %vm3906_vm10, %v1607_v19  ;;  %v1867_v19 = vld [vmem:[%s4222_s4 + $0x1d0] sm:$0xff] }
 0x38d   :  { %v1641_v21 = vpop.permute.xlu1 %1640  ;;  %v1516_v23 = vpop.permute.xlu0 %1515 }
 0x38e   :  { %1643 = vst.msk [vmem:[#allocation2 + $0x3] sm:$0x1] %vm3902_vm9, %v1641_v21  ;;  %1521 = vst.msk [vmem:[#allocation2] sm:$0x1] %vm3902_vm9, %v1516_v23  ;;  %v3027_v21 = vpack.c.bf16 %v1850_v17, %v1849_v16  ;;  %v3029_v23 = vpack.c.bf16 %v1868_v20, %v1867_v19  ;;  %v1934_v16 = vld [vmem:[%s4222_s4 + $0x3e8] sm:$0xff]  ;;  %v1917_v20 = vld [vmem:[%s4222_s4 + $0x360] sm:$0xff] }
 0x391   :  { %v1646_v24 = vpop.permute.xlu1 %1645  ;;  %v1524_v8 = vpop.permute.xlu0 %1523 }
 0x392   :  { %1648 = vst.msk [vmem:[#allocation2 + $0x3] sm:$0x1] %vm3906_vm10, %v1646_v24  ;;  %1529 = vst.msk [vmem:[#allocation2] sm:$0x1] %vm3906_vm10, %v1524_v8  ;;  %v1851_v24 = vld [vmem:[%s4222_s4 + $0x150] sm:$0xff]  ;;  %v1852_v8 = vld [vmem:[%s4222_s4 + $0x158] sm:$0xff] }
 0x395   :  { %v1569_v26 = vpop.permute.xlu1 %1568  ;;  %v1612_v27 = vpop.permute.xlu0 %1611 }
 0x396   :  { %1614 = vst.msk [vmem:[#allocation2 + $0x2] sm:$0x1] %vm3924_vm13, %v1612_v27  ;;  %v3031_v27 = vpack.c.bf16 %v1852_v8, %v1851_v24  ;;  %v1936_v24 = vld [vmem:[%s4222_s4 + $0x3f8] sm:$0xff] }
 0x399   :  { %v1651_v29 = vpop.permute.xlu1 %1650  ;;  %v1564_v30 = vpop.permute.xlu0 %1563 }
 0x39a   :  { %1653 = vst.msk [vmem:[#allocation2 + $0x3] sm:$0x1] %vm3924_vm13, %v1651_v29 }
 0x39b   :  { %1566 = vst.msk [vmem:[#allocation2 + $0x1] sm:$0x1] %vm3902_vm9, %v1564_v30  ;;  %v1853_v30 = vld [vmem:[%s4222_s4 + $0x160] sm:$0xff] }
 0x39c   :  { %1571 = vst.msk [vmem:[#allocation2 + $0x1] sm:$0x1] %vm3906_vm10, %v1569_v26  ;;  %v1870_v26 = vld [vmem:[%s4222_s4 + $0x1e8] sm:$0xff] }
 0x39d   :  { %v1574_v37 = vpop.permute.xlu1 %1573  ;;  %v1532_v31 = vpop.permute.xlu0 %1531  ;;  %v3033_v29 = vpack.c.bf16 %v1870_v26, %v1869_v25  ;;  %v1919_v26 = vld [vmem:[%s4222_s4 + $0x370] sm:$0xff] }
 0x39e   :  { %1576 = vst.msk [vmem:[#allocation2 + $0x1] sm:$0x1] %vm3924_vm13, %v1574_v37  ;;  %1537 = vst.msk [vmem:[#allocation2] sm:$0x1] %vm3924_vm13, %v1532_v31  ;;  %v1854_v37 = vld [vmem:[%s4222_s4 + $0x168] sm:$0xff]  ;;  %v1871_v31 = vld [vmem:[%s4222_s4 + $0x1f0] sm:$0xff] }
 0x3a1   :  { %v1795_v32 = vpop.permute.xlu1 %1794  ;;  %v1756_v33 = vpop.permute.xlu0 %1755 }
 0x3a2   :  { %1797 = vst.msk [vmem:[#allocation2 + $0x7] sm:$0x1] %vm3902_vm9, %v1795_v32  ;;  %1758 = vst.msk [vmem:[#allocation2 + $0x6] sm:$0x1] %vm3902_vm9, %v1756_v33  ;;  %v1872_v32 = vld [vmem:[%s4222_s4 + $0x1f8] sm:$0xff]  ;;  %v3035_v33 = vpack.c.bf16 %v1854_v37, %v1853_v30  ;;  %v1964_v30 = vsub.s32 6, %v3594_v41 }
 0x3a5   :  { %v1800_v34 = vpop.permute.xlu1 %1799  ;;  %v1761_v35 = vpop.permute.xlu0 %1760 }
 0x3a6   :  { %1802 = vst.msk [vmem:[#allocation2 + $0x7] sm:$0x1] %vm3906_vm10, %v1800_v34  ;;  %1763 = vst.msk [vmem:[#allocation2 + $0x6] sm:$0x1] %vm3906_vm10, %v1761_v35  ;;  %v3037_v34 = vpack.c.bf16 %v1872_v32, %v1871_v31  ;;  %v1855_v35 = vld [vmem:[%s4222_s4 + $0x170] sm:$0xff]  ;;  %v2259_v31 = vld [vmem:[%s4223_s5] sm:$0xff] }
 0x3a7   :  { %v2260_v32 = vld [vmem:[%s4223_s5 + $0x8] sm:$0xff] }
 0x3a9   :  { %v1718_v36 = vpop.permute.xlu1 %1717  ;;  %v1679_v22 = vpop.permute.xlu0 %1678 }
 0x3aa   :  { %1720 = vst.msk [vmem:[#allocation2 + $0x5] sm:$0x1] %vm3902_vm9, %v1718_v36  ;;  %1681 = vst.msk [vmem:[#allocation2 + $0x4] sm:$0x1] %vm3902_vm9, %v1679_v22  ;;  %v1856_v36 = vld [vmem:[%s4222_s4 + $0x178] sm:$0xff]  ;;  %v1921_v22 = vld [vmem:[%s4222_s4 + $0x380] sm:$0xff] }
 0x3ad   :  { %v1723_v38 = vpop.permute.xlu1 %1722  ;;  %v1684_v18 = vpop.permute.xlu0 %1683 }
 0x3ae   :  { %1725 = vst.msk [vmem:[#allocation2 + $0x5] sm:$0x1] %vm3906_vm10, %v1723_v38  ;;  %1686 = vst.msk [vmem:[#allocation2 + $0x4] sm:$0x1] %vm3906_vm10, %v1684_v18  ;;  %v1922_v38 = vld [vmem:[%s4222_s4 + $0x388] sm:$0xff]  ;;  %v3039_v18 = vpack.c.bf16 %v1856_v36, %v1855_v35  ;;  %v2263_v35 = vld [vmem:[%s4223_s5 + $0x20] sm:$0xff] }
 0x3af   :  { %v2264_v36 = vld [vmem:[%s4223_s5 + $0x28] sm:$0xff] }
 0x3b1   :  { %v1728_v39 = vpop.permute.xlu1 %1727  ;;  %v1689_v40 = vpop.permute.xlu0 %1688 }
 0x3b2   :  { %1730 = vst.msk [vmem:[#allocation2 + $0x5] sm:$0x1] %vm3924_vm13, %v1728_v39  ;;  %1691 = vst.msk [vmem:[#allocation2 + $0x4] sm:$0x1] %vm3924_vm13, %v1689_v40  ;;  %v1948_v39 = vsub.s32 2, %v3594_v41  ;;  %v3073_v40 = vpack.c.bf16 %v1922_v38, %v1921_v22  ;;  %v3112_v22 = vpack.c.bf16 %v2264_v36, %v2263_v35  ;;  %v2265_v38 = vld [vmem:[%s4223_s5 + $0x30] sm:$0xff] }
 0x3b5   :  { %v1805_v42 = vpop.permute.xlu1 %1804  ;;  %v1766_v43 = vpop.permute.xlu0 %1765 }
 0x3b6   :  { %1807 = vst.msk [vmem:[#allocation2 + $0x7] sm:$0x1] %vm3924_vm13, %v1805_v42  ;;  %1768 = vst.msk [vmem:[#allocation2 + $0x6] sm:$0x1] %vm3924_vm13, %v1766_v43  ;;  %v1905_v42 = vld [vmem:[%s4222_s4 + $0x300] sm:$0xff]  ;;  %v1906_v43 = vld [vmem:[%s4222_s4 + $0x308] sm:$0xff] }
 0x3b7   :  { %v3075_v47 = vpack.c.bf16 %v1906_v43, %v1905_v42 }
 0x3bd   :  { %v3981_v53 = vld [vmem:[#allocation2] sm:$0xff] }
 0x3be   :  { %v1945_v55 = vrot.slane %v3981_v53, %v1944_v44  ;;  %v1961_v56 = vrot.slane %v3981_v53, %v1960_v45  ;;  %v1941_v57 = vrot.slane %v3981_v53, %v1940_v46  ;;  %v1957_v58 = vrot.slane %v3981_v53, %v1956_v49  ;;  %v1923_v45 = vld [vmem:[%s4222_s4 + $0x390] sm:$0xff]  ;;  %v1924_v46 = vld [vmem:[%s4222_s4 + $0x398] sm:$0xff] }
 0x3bf   :  { %v1953_v62 = vrot.slane %v3981_v53, %v1952_v50  ;;  %v1968_v44 = vsub.s32 7, %v3594_v41  ;;  %v1949_v48 = vrot.slane %v3981_v53, %v1948_v39  ;;  %v3077_v49 = vpack.c.bf16 %v1924_v46, %v1923_v45  ;;  %v1907_v50 = vld [vmem:[%s4222_s4 + $0x310] sm:$0xff]  ;;  %v2262_v41 = vld [vmem:[%s4223_s5 + $0x18] sm:$0xff] }
 0x3c0   :  { %2042 = vmatprep.mubr.f32.mxu1 %v1945_v55  ;;  %2182 = vmatprep.mubr.f32.mxu0 %v1961_v56  ;;  %v1926_v55 = vld [vmem:[%s4222_s4 + $0x3a8] sm:$0xff]  ;;  %v3079_v56 = vpack.c.bf16 %v1908_v52, %v1907_v50  ;;  %v1965_v37 = vrot.slane %v3981_v53, %v1964_v30 }
 0x3c1   :  { %2043 = vmatmul.mubr.f32.vlgmr.msra.gmra.mrb[36].mxu1 %v1941_v57  ;;  %2183 = vmatmul.mubr.f32.vlgmr.msra.gmra.mrb[18].mxu0 %v1957_v58  ;;  %v1969_v51 = vrot.slane %v3981_v53, %v1968_v44  ;;  %v1909_v58 = vld [vmem:[%s4222_s4 + $0x320] sm:$0xff] }
 0x3c2   :  { %3012 = vmatpush3.bf16.msra.mxu1 %v3011_v54  ;;  %2112 = vmatprep.mubr.f32.mxu1 %v1953_v62  ;;  %v1925_v54 = vld [vmem:[%s4222_s4 + $0x3a0] sm:$0xff] }
 0x3c3   :  { %3014 = vmatprep.subr.bf16.mxu1 %v3013_v59  ;;  %2917 = vmatprep.mubr.msk.f32.mxu0 %vm3186_vm0, %v3187_v6  ;;  %v1848_v6 = vld [vmem:[%s4222_s4 + $0x138] sm:$0xff]  ;;  %v3081_v57 = vpack.c.bf16 %v1926_v55, %v1925_v54  ;;  %v1910_v59 = vld [vmem:[%s4222_s4 + $0x328] sm:$0xff] }
 0x3c4   :  { %v3023_v14 = vpack.c.bf16 %v1848_v6, %v1847_v11  ;;  %v3083_v62 = vpack.c.bf16 %v1910_v59, %v1909_v58  ;;  %v1932_v11 = vld [vmem:[%s4222_s4 + $0x3d8] sm:$0xff]  ;;  %v30_v59 = vld [vmem:[%s4224_s6 + $0x3] sm:$0x1] }
 0x3c6   :  { %3016 = vmatpush3.bf16.msra.mxu1 %v3015_v1  ;;  %v1912_v1 = vld [vmem:[%s4222_s4 + $0x338] sm:$0xff] }
 0x3c7   :  { %3018 = vmatprep.subr.bf16.mxu1 %v3017_v28  ;;  %v1929_v28 = vld [vmem:[%s4222_s4 + $0x3c0] sm:$0xff]  ;;  %v3087_v4 = vpack.c.bf16 %v1912_v1, %v1911_v0 }
 0x3c8   :  { %v3089_v5 = vpack.c.bf16 %v1930_v2, %v1929_v28 }
 0x3ca   :  { %3020 = vmatpush3.bf16.msra.mxu1 %v3019_v9  ;;  %v1914_v9 = vld [vmem:[%s4222_s4 + $0x348] sm:$0xff] }
 0x3cb   :  { %3022 = vmatprep.subr.bf16.mxu1 %v3021_v10  ;;  %v1931_v10 = vld [vmem:[%s4222_s4 + $0x3d0] sm:$0xff]  ;;  %v3091_v6 = vpack.c.bf16 %v1914_v9, %v1913_v7 }
 0x3cc   :  { %v3093_v12 = vpack.c.bf16 %v1932_v11, %v1931_v10 }
 0x3ce   :  { %3024 = vmatpush3.bf16.msra.mxu1 %v3023_v14  ;;  %v1916_v14 = vld [vmem:[%s4222_s4 + $0x358] sm:$0xff] }
 0x3cf   :  { %3026 = vmatprep.subr.bf16.mxu1 %v3025_v15  ;;  %v1933_v15 = vld [vmem:[%s4222_s4 + $0x3e0] sm:$0xff]  ;;  %v3095_v17 = vpack.c.bf16 %v1916_v14, %v1915_v13 }
 0x3d0   :  { %v3097_v19 = vpack.c.bf16 %v1934_v16, %v1933_v15 }
 0x3d2   :  { %3028 = vmatpush3.bf16.msra.mxu1 %v3027_v21  ;;  %v1918_v21 = vld [vmem:[%s4222_s4 + $0x368] sm:$0xff] }
 0x3d3   :  { %3030 = vmatprep.subr.bf16.mxu1 %v3029_v23  ;;  %v1935_v23 = vld [vmem:[%s4222_s4 + $0x3f0] sm:$0xff]  ;;  %v3099_v8 = vpack.c.bf16 %v1918_v21, %v1917_v20 }
 0x3d4   :  { %v3101_v25 = vpack.c.bf16 %v1936_v24, %v1935_v23 }
 0x3d6   :  { %3032 = vmatpush3.bf16.msra.mxu1 %v3031_v27  ;;  %v1920_v27 = vld [vmem:[%s4222_s4 + $0x378] sm:$0xff] }
 0x3d7   :  { %3034 = vmatprep.subr.bf16.mxu1 %v3033_v29  ;;  %v3103_v29 = vpack.c.bf16 %v1920_v27, %v1919_v26 }
 0x3da   :  { %3036 = vmatpush3.bf16.msra.mxu1 %v3035_v33  ;;  %v2261_v33 = vld [vmem:[%s4223_s5 + $0x10] sm:$0xff] }
 0x3db   :  { %3038 = vmatprep.subr.bf16.mxu1 %v3037_v34  ;;  %v3106_v34 = vpack.c.bf16 %v2260_v32, %v2259_v31  ;;  %v3109_v53 = vpack.c.bf16 %v2262_v41, %v2261_v33 }
 0x3dd   :  { %3107 = vmatpush3.bf16.msra.mxu0 %v3106_v34 }
 0x3de   :  { %3040 = vmatpush3.bf16.msra.mxu1 %v3039_v18  ;;  %3108 = vmatprep.subr.bf16.mxu0 %v3185_v3  ;;  %v2266_v18 = vld [vmem:[%s4223_s5 + $0x38] sm:$0xff] }
 0x3df   :  { %3074 = vmatprep.subr.bf16.mxu1 %v3073_v40  ;;  %v3115_v39 = vpack.c.bf16 %v2266_v18, %v2265_v38 }
 0x3e1   :  { %2113 = vmatmul.mubr.f32.vlgmr.msra.gmra.mrb[38].mxu1 %v1949_v48  ;;  %3110 = vmatpush3.bf16.msra.mxu0 %v3109_v53 }
 0x3e2   :  { %3076 = vmatpush3.bf16.msra.mxu1 %v3075_v47  ;;  %2252 = vmatprep.mubr.f32.mxu1 %v1969_v51 }
 0x3e3   :  { %3078 = vmatprep.subr.bf16.mxu1 %v3077_v49  ;;  %3111 = vmatprep.subr.bf16.mxu0 %v3185_v3 }
 0x3e5   :  { %3113 = vmatpush3.bf16.msra.mxu0 %v3112_v22 }
 0x3e6   :  { %3080 = vmatpush3.bf16.msra.mxu1 %v3079_v56  ;;  %3114 = vmatprep.subr.bf16.mxu0 %v3185_v3  ;;  %v29_v3 = vld [vmem:[%s4224_s6 + $0x2] sm:$0x1]  ;;  %s2361_s6 = sshll.u32 %s3192_s25, 4  ;;  %s2362_s6 = int_to_ptr.vmem [resolvable:$true] %s2361_s6 }
 0x3e7   :  { %3082 = vmatprep.subr.bf16.mxu1 %v3081_v57  ;;  %s3161_s26 = scalar_lea.vmem %s2362_s6, 16  ;;  %s3165_s3 = scalar_lea.vmem %s2362_s6, 32 }
 0x3e8   :  { %p3162_p0 = scmp.ne.s32.totalorder %s2362_s6, %s3161_s26  ;;  %p3166_p1 = scmp.lt.s32.totalorder %s2362_s6, %s2362_s6 }
 0x3e9   :  { %3116 = vmatpush3.bf16.msra.mxu0 %v3115_v39  ;;  %p3167_p2 = scmp.lt.s32.totalorder %s3165_s3, %s3161_s26 }
 0x3ea   :  { %3084 = vmatpush3.bf16.msra.mxu1 %v3083_v62 }
 0x3eb   :  { %3086 = vmatprep.subr.bf16.mxu1 %v3085_v63  ;;  %p3168_p3 = por %p3167_p2, %p3166_p1 }
 0x3ed   :  { %p3169_p4 = pnand %p3168_p3, %p3162_p0 }
 0x3ee   :  { %3088 = vmatpush3.bf16.msra.mxu1 %v3087_v4 }
 0x3ef   :  { %3090 = vmatprep.subr.bf16.mxu1 %v3089_v5 }
 0x3f2   :  { %3092 = vmatpush3.bf16.msra.mxu1 %v3091_v6 }
 0x3f3   :  { %3094 = vmatprep.subr.bf16.mxu1 %v3093_v12 }
 0x3f6   :  { %3096 = vmatpush3.bf16.msra.mxu1 %v3095_v17 }
 0x3f7   :  { %3098 = vmatprep.subr.bf16.mxu1 %v3097_v19 }
 0x3fa   :  { %3100 = vmatpush3.bf16.msra.mxu1 %v3099_v8 }
 0x3fb   :  { %3102 = vmatprep.subr.bf16.mxu1 %v3101_v25 }
 0x3fe   :  { %3104 = vmatpush3.bf16.msra.mxu1 %v3103_v29 }
 0x401   :  { %2253 = vmatmul.mubr.f32.vlgmr.msra.gmra.mrb[40].mxu1 %v1965_v37 }
 0x494   :  { %v2593_v40 = vpop.f32.mrb[36].mxu1  ;;  %v2663_v42 = vpop.f32.mrb[18].mxu0 }
 0x495   :  { %v2594_v43 = vpop.f32.mrb[37].mxu1  ;;  %v2664_v44 = vpop.f32.mrb[19].mxu0 }
 0x496   :  { %v2595_v45 = vadd.f32 %v2594_v43, %v2593_v40  ;;  %v2665_v46 = vadd.f32 %v2664_v44, %v2663_v42 }
 0x498   :  { %v2045_v49 = vadd.f32 %v2595_v45, %v29_v3 }
 0x4b4   :  { %v2628_v47 = vpop.f32.mrb[38].mxu1 }
 0x4b5   :  { %v2629_v48 = vpop.f32.mrb[39].mxu1 }
 0x4b6   :  { %v2630_v50 = vadd.f32 %v2629_v48, %v2628_v47 }
 0x4b8   :  { %v2115_v52 = vadd.f32 %v2630_v50, %v2045_v49 }
 0x4ba   :  { %v2185_v51 = vadd.f32 %v2665_v46, %v2115_v52 }
 0x4d4   :  { %v2698_v54 = vpop.f32.mrb[40].mxu1 }
 0x4d5   :  { %v2699_v55 = vpop.f32.mrb[41].mxu1 }
 0x4d6   :  { %v2700_v56 = vadd.f32 %v2699_v55, %v2698_v54 }
 0x4d8   :  { %v2255_v57 = vadd.f32 %v2700_v56, %v2185_v51 }
 0x4da   :  { %v2258_v58 = vmax.f32 %v2255_v57, 0.0 }
 0x4dc   :  { %2918 = vmatmul.mubr.msk.f32.vlgmr.msra.gmra.mrb[20].mxu0 %vm2267_vm14, %v2258_v58 }
 0x5af   :  { %v2337_v60 = vpop.f32.mrb[20].mxu0 }
 0x5b0   :  { %v2338_v61 = vadd.f32 %v2337_v60, %v30_v59  ;;  %v2919_v62 = vpop.f32.mrb[21].mxu0 }
 0x5b2   :  { %v2342_v63 = vsel %vm2341_vm15, %v2338_v61, -inf }
 0x5b3   :  { %2343 = vmax.xlane.f32.xlu0 %v2342_v63 }
 0x640   :  { %v2344_v0 = vpop.xlane.xlu0 %2343 }
 0x641   :  { %v2345_v1 = vsub.f32 %v2338_v61, %v2344_v0 }
 0x643   :  { %v2346_v28 = vmul.f32 1.442695, %v2345_v1 }
 0x645   :  { %3157 = vpow2.f32 %v2346_v28 }
 0x64f   :  { %v3158_v2 = vpop.eup %3157 }
 0x650   :  { %v2348_v4 = vsel %vm2341_vm15, %v3158_v2, 0.0 }
 0x651   :  { %2349 = vadd.xlane.f32.xlu1 %v2348_v4 }
 0x6de   :  { %v2350_v5 = vpop.xlane.xlu1 %2349 }
 0x6df   :  { %3159 = vlog2.f32 %v2350_v5 }
 0x6e9   :  { %v3160_v7 = vpop.eup %3159 }
 0x6ea   :  { %v2352_v9 = vmul.f32 0.6931472, %v3160_v7 }
 0x6ec   :  { %v2353_v10 = vsub.f32 %v2345_v1, %v2352_v9 }
 0x6ee   :  { %2354 = vst.msk [vmem:[#allocation3] sm:$0x1] %vm2341_vm15, %v2353_v10 }
 0x6ef   :  { %3172 = shalt.err (!%p3169_p4)
}
 0x6f0   :  { %s3173_s29 = scalar_lea.hbm %s4225_s7, 16 }
 0x6f1   :  { %p3174_p5 = scmp.ne.s32.totalorder %s4225_s7, %s3173_s29  ;;  %p3177_p6 = scmp.lt.u32.totalorder %s3173_s29, %s4225_s7 }
 0x6f3   :  { %p3179_p7 = pnand %p3177_p6, %p3174_p5 }
 0x6f5   :  { %3182 = shalt.err (!%p3179_p7)
}
 0x6f6   :  { %2364 = dma.vmem_to_hbm [thread:$0]  %s2362_s6, 16, %s4225_s7, [#allocation4]  }
 0x6f7   :  { %3183 = dma.done.wait [#allocation4], 16  }
 0x6f8   :  { %3184 = vsyncadd [#allocation4], 4294967280 }
 0x6f9   :  { %2368 = vsyncpa [#allocation4], 1 }

</bundles_post_ra>
